<compile_context>
chip_gen: v7x
topology: tpu7x:2x2x1
jax: 0.10.0
libtpu: 0.0.40
codegen_flags: <defaults>
</compile_context>

<pallas_src>
import functools
import math

import jax
import jax.numpy as jnp
import numpy as np
from jax import lax
from jax.experimental import pallas as pl
from jax.experimental.pallas import tpu as pltpu


def _mha_fused_kernel(*refs, num_heads, d_qk, d_v,
                      static_scale, static_bias, has_scale_blk, has_bias_blk):
    """One (batch, q-tile) step: all heads + fused output projection.

    K/V projections are computed only when pl.program_id(1) == 0 and cached in
    VMEM scratch for the remaining q-tiles of the same batch element.
    """
    refs = list(refs)
    idx = 0
    scale_ref = None
    bias_ref = None
    if has_scale_blk:
        scale_ref = refs[idx]; idx += 1
    if has_bias_blk:
        bias_ref = refs[idx]; idx += 1
    (q_ref, k_ref, v_ref,
     wq_ref, bq_ref, wk_ref, bk_ref, wv_ref, bv_ref,
     wo_ref, bo_ref,
     o_ref,
     kproj_ref, vproj_ref, headbuf_ref) = refs[idx:]

    qi = pl.program_id(1)

    # ---- K/V projections: computed ONCE per batch, cached in VMEM scratch ----
    @pl.when(qi == 0)
    def _():
        k = k_ref[0]                                               # (S2, E2) bf16
        v = v_ref[0]                                               # (S2, E3) bf16
        kproj_ref[...] = (jnp.dot(k, wk_ref[...],
                                  preferred_element_type=jnp.float32)
                          + bk_ref[...]).astype(jnp.bfloat16)      # (S2, H*d_qk)
        vproj_ref[...] = (jnp.dot(v, wv_ref[...],
                                  preferred_element_type=jnp.float32)
                          + bv_ref[...]).astype(jnp.bfloat16)      # (S2, H*d_v)

    # ---- Q projection for this q-tile (scalar scale folded in, f32 dropped) --
    q = q_ref[0]                                                   # (TQ, E1) bf16
    Q = jnp.dot(q, wq_ref[...], preferred_element_type=jnp.float32) + bq_ref[...]
    if (not has_scale_blk) and static_scale != 1.0:
        Q = Q * static_scale                       # cheap: (TQ, H*d_qk) multiply
    Qb = Q.astype(jnp.bfloat16)                    # no f32 copy stays live

    Kb = kproj_ref[...]                            # (S2, H*d_qk) bf16 (cached)
    Vb = vproj_ref[...]                            # (S2, H*d_v)  bf16 (cached)
    TQ = Qb.shape[0]
    S2 = Kb.shape[0]

    # Hoist the (.., S2) -> (TQ, S2) broadcasts out of the unrolled head loop.
    scale_b = (jnp.broadcast_to(scale_ref[0], (TQ, S2))
               if has_scale_blk else None)
    bias_b = (jnp.broadcast_to(bias_ref[0], (TQ, S2))
              if has_bias_blk else None)

    for h in range(num_heads):
        qh = Qb[:, h * d_qk:(h + 1) * d_qk]
        kh = Kb[:, h * d_qk:(h + 1) * d_qk]
        # Contract the last dims of both operands -> no K^T copy.
        s = lax.dot_general(qh, kh, (((1,), (1,)), ((), ())),
                            preferred_element_type=jnp.float32)   # (TQ, S2)
        if has_scale_blk:
            s = s * scale_b
        if has_bias_blk:
            s = s + bias_b
        elif static_bias != 0.0:
            s = s + static_bias
        # Numerically stable softmax with DEFERRED normalization: p stays
        # unnormalized (values in (0,1]); the divide happens on (TQ, d_v).
        s = s - jnp.max(s, axis=-1, keepdims=True)
        p = jnp.exp(s)
        denom = jnp.sum(p, axis=-1, keepdims=True)                 # (TQ, 1)
        oh = jnp.dot(p.astype(jnp.bfloat16), Vb[:, h * d_v:(h + 1) * d_v],
                     preferred_element_type=jnp.float32)           # (TQ, d_v)
        oh = oh * pl.reciprocal(denom, approx=True)                # EUP slot
        headbuf_ref[:, h * d_v:(h + 1) * d_v] = oh                 # f32 buffer

    # ONE lane-dense output projection over the full H*d_v contraction depth.
    concat = headbuf_ref[...].astype(jnp.bfloat16)                 # (TQ, H*d_v)
    out = (jnp.dot(concat, wo_ref[...], preferred_element_type=jnp.float32)
           + bo_ref[...])                                          # (TQ, E4)
    o_ref[0] = out.astype(o_ref.dtype)


def _normalize_score_term(x, B, S1, S2):
    """Bring a broadcastable score term to a compact (b, s1, s2) array WITHOUT
    materializing a full (B, S1, S2) tensor unless it truly varies per axis."""
    x = jnp.asarray(x, jnp.float32)
    while x.ndim < 3:
        x = x[None]
    b_dim = B if x.shape[0] == B else 1
    s1_dim = S1 if x.shape[1] == S1 else 1
    s2_dim = S2 if x.shape[2] == S2 else 1
    return jnp.broadcast_to(x, (b_dim, s1_dim, s2_dim))


def _vmem_capacity_bytes():
    try:
        return int(pltpu.get_tpu_info().vmem_capacity_bytes)
    except Exception:
        return 128 * 1024 * 1024


class MultiHeadAttentionPallas:
    def __init__(self, query_embedding_dimension, key_embedding_dimension,
                 value_embedding_dimension, query_and_key_projection_dimension,
                 value_projection_dimension, number_of_heads, dropout_p, *, key):
        self.query_embedding_dimension = query_embedding_dimension
        self.key_embedding_dimension = key_embedding_dimension
        self.value_embedding_dimension = value_embedding_dimension
        self.query_and_key_projection_dimension = query_and_key_projection_dimension
        self.value_projection_dimension = value_projection_dimension
        self.number_of_heads = number_of_heads
        self.dropout_p = dropout_p                      # eval-mode identity
        self.d_qk = query_and_key_projection_dimension // number_of_heads
        self.d_v = value_projection_dimension // number_of_heads

        H = number_of_heads
        ks = jax.random.split(key, 8)

        def init(k, shape, fan_in):
            bound = 1.0 / math.sqrt(fan_in)
            return jax.random.uniform(k, shape, jnp.float32, -bound, bound)

        # Per-head parameters (f32, reference layout).
        self.wq = init(ks[0], (H, query_embedding_dimension, self.d_qk), query_embedding_dimension)
        self.bq = init(ks[1], (H, 1, self.d_qk), query_embedding_dimension)
        self.wk = init(ks[2], (H, key_embedding_dimension, self.d_qk), key_embedding_dimension)
        self.bk = init(ks[3], (H, 1, self.d_qk), key_embedding_dimension)
        self.wv = init(ks[4], (H, value_embedding_dimension, self.d_v), value_embedding_dimension)
        self.bv = init(ks[5], (H, 1, self.d_v), value_embedding_dimension)
        self.wo = init(ks[6], (H * self.d_v, value_projection_dimension), H * self.d_v)
        self.bo = init(ks[7], (1, value_projection_dimension), H * self.d_v)

        # Fused (head-major column blocks) kernel layouts; bf16 MXU inputs.
        self.wq_fused = jnp.transpose(self.wq, (1, 0, 2)).reshape(
            query_embedding_dimension, H * self.d_qk).astype(jnp.bfloat16)
        self.bq_fused = self.bq.reshape(1, H * self.d_qk)                   # f32
        self.wk_fused = jnp.transpose(self.wk, (1, 0, 2)).reshape(
            key_embedding_dimension, H * self.d_qk).astype(jnp.bfloat16)
        self.bk_fused = self.bk.reshape(1, H * self.d_qk)                   # f32
        self.wv_fused = jnp.transpose(self.wv, (1, 0, 2)).reshape(
            value_embedding_dimension, H * self.d_v).astype(jnp.bfloat16)
        self.bv_fused = self.bv.reshape(1, H * self.d_v)                    # f32
        self.wo_b = self.wo.astype(jnp.bfloat16)

    def __call__(self, query, key, value, attention_scale=None, attention_bias=None):
        B, S1, E1 = query.shape
        _, S2, E2 = key.shape
        _, _, E3 = value.shape
        H, d_qk, d_v = self.number_of_heads, self.d_qk, self.d_v
        E4 = self.value_projection_dimension

        # ---- scalar scale/bias are folded statically (no per-step DMA) -------
        scale_is_static = attention_scale is None or isinstance(attention_scale, (int, float))
        bias_is_static = attention_bias is None or isinstance(attention_bias, (int, float))
        static_scale = (1.0 / math.sqrt(E1)) if attention_scale is None else (
            float(attention_scale) if scale_is_static else 1.0)
        static_bias = 0.0 if attention_bias is None else (
            float(attention_bias) if bias_is_static else 0.0)
        scale_arr = None if scale_is_static else _normalize_score_term(attention_scale, B, S1, S2)
        bias_arr = None if bias_is_static else _normalize_score_term(attention_bias, B, S1, S2)

        # ---- query-sequence tiling ------------------------------------------
        vmem_cap = _vmem_capacity_bytes()
        max_tq = 512 if vmem_cap > (64 << 20) else 256   # smaller tiles on v7x

        S1p = S1
        if S1 > max_tq and S1 % 128 != 0:
            S1p = ((S1 + 127) // 128) * 128              # pad instead of huge block
        TQ = S1p
        for t in (max_tq, 256, 128):
            if S1p >= t and S1p % t == 0:
                TQ = t
                break
        n_q = S1p // TQ

        q_in = query
        if S1p != S1:
            q_in = jnp.pad(query, ((0, 0), (0, S1p - S1), (0, 0)))
            if scale_arr is not None and scale_arr.shape[1] == S1:
                scale_arr = jnp.pad(scale_arr, ((0, 0), (0, S1p - S1), (0, 0)))
            if bias_arr is not None and bias_arr.shape[1] == S1:
                bias_arr = jnp.pad(bias_arr, ((0, 0), (0, S1p - S1), (0, 0)))

        def sb_spec(arr):
            b_dim, s1_dim, s2_dim = arr.shape
            blk_s1 = TQ if s1_dim != 1 else 1
            if b_dim != 1 and blk_s1 != 1:
                imap = lambda b, qi: (b, qi, 0)
            elif b_dim != 1:
                imap = lambda b, qi: (b, 0, 0)
            elif blk_s1 != 1:
                imap = lambda b, qi: (0, qi, 0)
            else:
                imap = lambda b, qi: (0, 0, 0)
            return pl.BlockSpec((1, blk_s1, s2_dim), imap)

        # bf16 activations for the MXU (halves HBM read bytes); f32 accumulate.
        q_b = q_in.astype(jnp.bfloat16)
        k_b = key.astype(jnp.bfloat16)
        v_b = value.astype(jnp.bfloat16)

        inputs, in_specs = [], []
        if scale_arr is not None:
            inputs.append(scale_arr); in_specs.append(sb_spec(scale_arr))
        if bias_arr is not None:
            inputs.append(bias_arr); in_specs.append(sb_spec(bias_arr))
        inputs += [q_b, k_b, v_b,
                   self.wq_fused, self.bq_fused, self.wk_fused, self.bk_fused,
                   self.wv_fused, self.bv_fused, self.wo_b, self.bo]
        in_specs += [
            pl.BlockSpec((1, TQ, E1), lambda b, qi: (b, qi, 0)),       # query
            pl.BlockSpec((1, S2, E2), lambda b, qi: (b, 0, 0)),        # key (used at qi==0)
            pl.BlockSpec((1, S2, E3), lambda b, qi: (b, 0, 0)),        # value (used at qi==0)
            pl.BlockSpec((E1, H * d_qk), lambda b, qi: (0, 0)),        # Wq
            pl.BlockSpec((1, H * d_qk), lambda b, qi: (0, 0)),         # bq
            pl.BlockSpec((E2, H * d_qk), lambda b, qi: (0, 0)),        # Wk
            pl.BlockSpec((1, H * d_qk), lambda b, qi: (0, 0)),         # bk
            pl.BlockSpec((E3, H * d_v), lambda b, qi: (0, 0)),         # Wv
            pl.BlockSpec((1, H * d_v), lambda b, qi: (0, 0)),          # bv
            pl.BlockSpec((H * d_v, E4), lambda b, qi: (0, 0)),         # Wo
            pl.BlockSpec((1, E4), lambda b, qi: (0, 0)),               # bo
        ]

        kernel = functools.partial(
            _mha_fused_kernel, num_heads=H, d_qk=d_qk, d_v=d_v,
            static_scale=static_scale, static_bias=static_bias,
            has_scale_blk=scale_arr is not None,
            has_bias_blk=bias_arr is not None)

        vmem_limit = max(32 * 1024 * 1024,
                         min(int(vmem_cap * 0.6), 96 * 1024 * 1024))

        out = pl.pallas_call(
            kernel,
            out_shape=jax.ShapeDtypeStruct((B, S1p, E4), jnp.float32),
            grid_spec=pltpu.PrefetchScalarGridSpec(
                num_scalar_prefetch=0,
                grid=(B, n_q),
                in_specs=in_specs,
                out_specs=pl.BlockSpec((1, TQ, E4), lambda b, qi: (b, qi, 0)),
                scratch_shapes=[
                    pltpu.VMEM((S2, H * d_qk), jnp.bfloat16),   # cached projected K
                    pltpu.VMEM((S2, H * d_v), jnp.bfloat16),    # cached projected V
                    pltpu.VMEM((TQ, H * d_v), jnp.float32),     # concatenated head outs
                ],
            ),
            compiler_params=pltpu.CompilerParams(
                # batch axis parallel (megacore sharding on v7x); q-tile axis
                # arbitrary because the projected-K/V scratch is carried across
                # qi steps of the same batch element.
                dimension_semantics=("parallel", "arbitrary"),
                vmem_limit_bytes=vmem_limit),
        )(*inputs)

        if S1p != S1:
            out = out[:, :S1, :]
        return out


def reference_mha(mha, query, key, value, attention_scale=None, attention_bias=None):
    """Pure-JAX f32 reference mirroring the PyTorch module (eval mode, no dropout)."""
    B, S1, E1 = query.shape
    _, S2, _ = key.shape
    if attention_scale is None:
        attention_scale = 1.0 / math.sqrt(E1)
    if attention_bias is None:
        attention_bias = 0.0
    scale = jnp.broadcast_to(jnp.asarray(attention_scale, jnp.float32), (B, S1, S2))
    bias = jnp.broadcast_to(jnp.asarray(attention_bias, jnp.float32), (B, S1, S2))
    head_outputs = []
    for h in range(mha.number_of_heads):
        Q = query @ mha.wq[h] + mha.bq[h]
        K = key @ mha.wk[h] + mha.bk[h]
        V = value @ mha.wv[h] + mha.bv[h]
        s = jnp.einsum("bqd,bkd->bqk", Q, K) * scale + bias
        p = jax.nn.softmax(s, axis=-1)
        head_outputs.append(jnp.einsum("bqk,bkd->bqd", p, V))
    concat = jnp.concatenate(head_outputs, axis=-1)
    return concat @ mha.wo + mha.bo


if __name__ == "__main__":
    root = jax.random.PRNGKey(0)
    k_param, k_q, k_k, k_v, k_bias = jax.random.split(root, 5)

    B, S1, S2 = 2, 8, 8
    E1, E2, E3 = 32, 24, 40          # query / key / value embedding dims
    QK_PROJ, V_PROJ, HEADS = 32, 32, 4

    mha = MultiHeadAttentionPallas(
        query_embedding_dimension=E1,
        key_embedding_dimension=E2,
        value_embedding_dimension=E3,
        query_and_key_projection_dimension=QK_PROJ,
        value_projection_dimension=V_PROJ,
        number_of_heads=HEADS,
        dropout_p=0.1,               # identity in eval mode
        key=k_param,
    )

    query = jax.random.normal(k_q, (B, S1, E1), jnp.float32)
    key = jax.random.normal(k_k, (B, S2, E2), jnp.float32)
    value = jax.random.normal(k_v, (B, S2, E3), jnp.float32)
    attn_bias = 0.1 * jax.random.normal(k_bias, (B, 1, S2), jnp.float32)  # broadcastable

    # Case 1: default scalar scale (folded into Q, no scale DMA) + varying bias.
    out1 = mha(query, key, value, attention_scale=None, attention_bias=attn_bias)
    out1 = jax.block_until_ready(out1)
    ref1 = reference_mha(mha, query, key, value, attention_scale=None, attention_bias=attn_bias)
    assert out1.shape == (B, S1, V_PROJ), out1.shape
    np.testing.assert_allclose(np.asarray(out1), np.asarray(ref1), rtol=2e-2, atol=2e-2)

    # Case 2: array-valued scale (block path), no bias.
    attn_scale_arr = jnp.full((B, 1, 1), 1.0 / math.sqrt(E1), jnp.float32)
    out2 = mha(query, key, value, attention_scale=attn_scale_arr, attention_bias=None)
    out2 = jax.block_until_ready(out2)
    ref2 = reference_mha(mha, query, key, value, attention_scale=attn_scale_arr, attention_bias=None)
    np.testing.assert_allclose(np.asarray(out2), np.asarray(ref2), rtol=2e-2, atol=2e-2)

    print("KERNEL_OK")
</pallas_src>

<mosaic_0001>
module attributes {stable_mosaic.version = 11 : i64} {
  func.func @_mha_fused_kernel(%arg0: i32, %arg1: i32, %arg2: memref<1x1x8xf32, #tpu.memory_space<vmem>>, %arg3: memref<1x8x32xbf16, #tpu.memory_space<vmem>>, %arg4: memref<1x8x24xbf16, #tpu.memory_space<vmem>>, %arg5: memref<1x8x40xbf16, #tpu.memory_space<vmem>>, %arg6: memref<32x32xbf16, #tpu.memory_space<vmem>>, %arg7: memref<1x32xf32, #tpu.memory_space<vmem>>, %arg8: memref<24x32xbf16, #tpu.memory_space<vmem>>, %arg9: memref<1x32xf32, #tpu.memory_space<vmem>>, %arg10: memref<40x32xbf16, #tpu.memory_space<vmem>>, %arg11: memref<1x32xf32, #tpu.memory_space<vmem>>, %arg12: memref<32x32xbf16, #tpu.memory_space<vmem>>, %arg13: memref<1x32xf32, #tpu.memory_space<vmem>>, %arg14: memref<1x8x32xf32, #tpu.memory_space<vmem>>, %arg15: memref<8x32xbf16, #tpu.memory_space<vmem>>, %arg16: memref<8x32xbf16, #tpu.memory_space<vmem>>, %arg17: memref<8x32xf32, #tpu.memory_space<vmem>>) attributes {dimension_semantics = [#tpu.dimension_semantics<parallel>, #tpu.dimension_semantics<arbitrary>], iteration_bounds = array<i64: 2, 1>, scalar_prefetch = 0 : i64, scratch_operands = 3 : i64, tpu.core_type = #tpu.core_type<tc>, window_params = [{transform_indices = @transform_0, window_bounds = array<i64: 1, 1, 8>}, {transform_indices = @transform_1, window_bounds = array<i64: 1, 8, 32>}, {transform_indices = @transform_2, window_bounds = array<i64: 1, 8, 24>}, {transform_indices = @transform_3, window_bounds = array<i64: 1, 8, 40>}, {pipeline_mode = #tpu.pipeline_mode<synchronous>, transform_indices = @transform_4, window_bounds = array<i64: 32, 32>}, {pipeline_mode = #tpu.pipeline_mode<synchronous>, transform_indices = @transform_5, window_bounds = array<i64: 1, 32>}, {pipeline_mode = #tpu.pipeline_mode<synchronous>, transform_indices = @transform_6, window_bounds = array<i64: 24, 32>}, {pipeline_mode = #tpu.pipeline_mode<synchronous>, transform_indices = @transform_7, window_bounds = array<i64: 1, 32>}, {pipeline_mode = #tpu.pipeline_mode<synchronous>, transform_indices = @transform_8, window_bounds = array<i64: 40, 32>}, {pipeline_mode = #tpu.pipeline_mode<synchronous>, transform_indices = @transform_9, window_bounds = array<i64: 1, 32>}, {pipeline_mode = #tpu.pipeline_mode<synchronous>, transform_indices = @transform_10, window_bounds = array<i64: 32, 32>}, {pipeline_mode = #tpu.pipeline_mode<synchronous>, transform_indices = @transform_11, window_bounds = array<i64: 1, 32>}, {transform_indices = @transform_12, window_bounds = array<i64: 1, 8, 32>}]} {
    %c0_i32 = arith.constant 0 : i32
    %0 = arith.cmpi eq, %arg1, %c0_i32 : i32
    %1 = arith.extui %0 : i1 to i32
    %c0_i32_0 = arith.constant 0 : i32
    %2 = arith.cmpi ne, %1, %c0_i32_0 : i32
    scf.if %2 {
      %c0_46 = arith.constant 0 : index
      %c0_47 = arith.constant 0 : index
      %c0_48 = arith.constant 0 : index
      %101 = vector.load %arg4[%c0_46, %c0_47, %c0_48] : memref<1x8x24xbf16, #tpu.memory_space<vmem>>, vector<1x8x24xbf16>
      %102 = vector.shape_cast %101 : vector<1x8x24xbf16> to vector<8x24xbf16>
      %c0_49 = arith.constant 0 : index
      %c0_50 = arith.constant 0 : index
      %c0_51 = arith.constant 0 : index
      %103 = vector.load %arg5[%c0_49, %c0_50, %c0_51] : memref<1x8x40xbf16, #tpu.memory_space<vmem>>, vector<1x8x40xbf16>
      %104 = vector.shape_cast %103 : vector<1x8x40xbf16> to vector<8x40xbf16>
      %c0_52 = arith.constant 0 : index
      %c0_53 = arith.constant 0 : index
      %105 = vector.load %arg8[%c0_52, %c0_53] : memref<24x32xbf16, #tpu.memory_space<vmem>>, vector<24x32xbf16>
      %cst_54 = arith.constant dense<0.000000e+00> : vector<8x32xf32>
      %106 = tpu.matmul %102, %105, %cst_54 {dimension_numbers = #tpu.dot_dimension_numbers<[1], [0], [0], [1], [0, 0, 1, 1], [], []>} : vector<8x24xbf16>, vector<24x32xbf16>, vector<8x32xf32> -> vector<8x32xf32>
      %c0_55 = arith.constant 0 : index
      %c0_56 = arith.constant 0 : index
      %107 = vector.load %arg9[%c0_55, %c0_56] : memref<1x32xf32, #tpu.memory_space<vmem>>, vector<1x32xf32>
      %108 = vector.broadcast %107 : vector<1x32xf32> to vector<8x32xf32>
      %109 = arith.addf %106, %108 : vector<8x32xf32>
      %110 = arith.truncf %109 : vector<8x32xf32> to vector<8x32xbf16>
      %c0_57 = arith.constant 0 : index
      %c0_58 = arith.constant 0 : index
      %111 = vector.load %arg15[%c0_57, %c0_58] : memref<8x32xbf16, #tpu.memory_space<vmem>>, vector<8x32xbf16>
      tpu.vector_store %arg15[%c0_57, %c0_58], %110 {strides = array<i32>} : memref<8x32xbf16, #tpu.memory_space<vmem>>, vector<8x32xbf16>,
      %c0_59 = arith.constant 0 : index
      %c0_60 = arith.constant 0 : index
      %112 = vector.load %arg10[%c0_59, %c0_60] : memref<40x32xbf16, #tpu.memory_space<vmem>>, vector<40x32xbf16>
      %cst_61 = arith.constant dense<0.000000e+00> : vector<8x32xf32>
      %113 = tpu.matmul %104, %112, %cst_61 {dimension_numbers = #tpu.dot_dimension_numbers<[1], [0], [0], [1], [0, 0, 1, 1], [], []>} : vector<8x40xbf16>, vector<40x32xbf16>, vector<8x32xf32> -> vector<8x32xf32>
      %c0_62 = arith.constant 0 : index
      %c0_63 = arith.constant 0 : index
      %114 = vector.load %arg11[%c0_62, %c0_63] : memref<1x32xf32, #tpu.memory_space<vmem>>, vector<1x32xf32>
      %115 = vector.broadcast %114 : vector<1x32xf32> to vector<8x32xf32>
      %116 = arith.addf %113, %115 : vector<8x32xf32>
      %117 = arith.truncf %116 : vector<8x32xf32> to vector<8x32xbf16>
      %c0_64 = arith.constant 0 : index
      %c0_65 = arith.constant 0 : index
      %118 = vector.load %arg16[%c0_64, %c0_65] : memref<8x32xbf16, #tpu.memory_space<vmem>>, vector<8x32xbf16>
      tpu.vector_store %arg16[%c0_64, %c0_65], %117 {strides = array<i32>} : memref<8x32xbf16, #tpu.memory_space<vmem>>, vector<8x32xbf16>,
    } else {
    }
    %c0 = arith.constant 0 : index
    %c0_1 = arith.constant 0 : index
    %c0_2 = arith.constant 0 : index
    %3 = vector.load %arg3[%c0, %c0_1, %c0_2] : memref<1x8x32xbf16, #tpu.memory_space<vmem>>, vector<1x8x32xbf16>
    %4 = vector.shape_cast %3 : vector<1x8x32xbf16> to vector<8x32xbf16>
    %c0_3 = arith.constant 0 : index
    %c0_4 = arith.constant 0 : index
    %5 = vector.load %arg6[%c0_3, %c0_4] : memref<32x32xbf16, #tpu.memory_space<vmem>>, vector<32x32xbf16>
    %cst = arith.constant dense<0.000000e+00> : vector<8x32xf32>
    %6 = tpu.matmul %4, %5, %cst {dimension_numbers = #tpu.dot_dimension_numbers<[1], [0], [0], [1], [0, 0, 1, 1], [], []>} : vector<8x32xbf16>, vector<32x32xbf16>, vector<8x32xf32> -> vector<8x32xf32>
    %c0_5 = arith.constant 0 : index
    %c0_6 = arith.constant 0 : index
    %7 = vector.load %arg7[%c0_5, %c0_6] : memref<1x32xf32, #tpu.memory_space<vmem>>, vector<1x32xf32>
    %8 = vector.broadcast %7 : vector<1x32xf32> to vector<8x32xf32>
    %9 = arith.addf %6, %8 : vector<8x32xf32>
    %cst_7 = arith.constant 0.176776692 : f32
    %10 = vector.broadcast %cst_7 : f32 to vector<8x32xf32>
    %11 = arith.mulf %9, %10 : vector<8x32xf32>
    %12 = arith.truncf %11 : vector<8x32xf32> to vector<8x32xbf16>
    %c0_8 = arith.constant 0 : index
    %c0_9 = arith.constant 0 : index
    %13 = vector.load %arg15[%c0_8, %c0_9] : memref<8x32xbf16, #tpu.memory_space<vmem>>, vector<8x32xbf16>
    %c0_10 = arith.constant 0 : index
    %c0_11 = arith.constant 0 : index
    %14 = vector.load %arg16[%c0_10, %c0_11] : memref<8x32xbf16, #tpu.memory_space<vmem>>, vector<8x32xbf16>
    %c0_12 = arith.constant 0 : index
    %c0_13 = arith.constant 0 : index
    %c0_14 = arith.constant 0 : index
    %15 = vector.load %arg2[%c0_12, %c0_13, %c0_14] : memref<1x1x8xf32, #tpu.memory_space<vmem>>, vector<1x1x8xf32>
    %16 = vector.shape_cast %15 : vector<1x1x8xf32> to vector<1x8xf32>
    %17 = vector.shape_cast %16 : vector<1x8xf32> to vector<1x8xf32>
    %18 = vector.broadcast %17 : vector<1x8xf32> to vector<8x8xf32>
    %19 = vector.extract_strided_slice %12 {offsets = [0, 0], sizes = [8, 8], strides = [1, 1]} : vector<8x32xbf16> to vector<8x8xbf16>
    %20 = vector.extract_strided_slice %13 {offsets = [0, 0], sizes = [8, 8], strides = [1, 1]} : vector<8x32xbf16> to vector<8x8xbf16>
    %cst_15 = arith.constant dense<0.000000e+00> : vector<8x8xf32>
    %21 = tpu.matmul %19, %20, %cst_15 {dimension_numbers = #tpu.dot_dimension_numbers<[1], [1], [0], [0], [0, 0, 1, 0], [], []>} : vector<8x8xbf16>, vector<8x8xbf16>, vector<8x8xf32> -> vector<8x8xf32>
    %22 = arith.addf %21, %18 : vector<8x8xf32>
    %cst_16 = arith.constant dense<0xFF800000> : vector<8xf32>
    %23 = vector.multi_reduction <maximumf>, %22, %cst_16 [1] : vector<8x8xf32> to vector<8xf32>
    %24 = vector.shape_cast %23 : vector<8xf32> to vector<8x1xf32>
    %25 = vector.broadcast %24 : vector<8x1xf32> to vector<8x8xf32>
    %26 = arith.subf %22, %25 : vector<8x8xf32>
    %27 = math.exp %26 : vector<8x8xf32>
    %cst_17 = arith.constant dense<0.000000e+00> : vector<8xf32>
    %28 = vector.multi_reduction <add>, %27, %cst_17 [1] : vector<8x8xf32> to vector<8xf32>
    %29 = vector.shape_cast %28 : vector<8xf32> to vector<8x1xf32>
    %30 = arith.truncf %27 : vector<8x8xf32> to vector<8x8xbf16>
    %31 = vector.extract_strided_slice %14 {offsets = [0, 0], sizes = [8, 8], strides = [1, 1]} : vector<8x32xbf16> to vector<8x8xbf16>
    %cst_18 = arith.constant dense<0.000000e+00> : vector<8x8xf32>
    %32 = tpu.matmul %30, %31, %cst_18 {dimension_numbers = #tpu.dot_dimension_numbers<[1], [0], [0], [1], [0, 0, 1, 1], [], []>} : vector<8x8xbf16>, vector<8x8xbf16>, vector<8x8xf32> -> vector<8x8xf32>
    %33 = tpu.reciprocal %29 {approx = true} : vector<8x1xf32> -> vector<8x1xf32>
    %34 = vector.broadcast %33 : vector<8x1xf32> to vector<8x8xf32>
    %35 = arith.mulf %32, %34 : vector<8x8xf32>
    %c0_19 = arith.constant 0 : index
    %c0_20 = arith.constant 0 : index
    %36 = vector.load %arg17[%c0_19, %c0_20] : memref<8x32xf32, #tpu.memory_space<vmem>>, vector<8x8xf32>
    tpu.vector_store %arg17[%c0_19, %c0_20], %35 {strides = array<i32>} : memref<8x32xf32, #tpu.memory_space<vmem>>, vector<8x8xf32>,
    %37 = vector.extract_strided_slice %12 {offsets = [0, 8], sizes = [8, 8], strides = [1, 1]} : vector<8x32xbf16> to vector<8x8xbf16>
    %38 = vector.extract_strided_slice %13 {offsets = [0, 8], sizes = [8, 8], strides = [1, 1]} : vector<8x32xbf16> to vector<8x8xbf16>
    %cst_21 = arith.constant dense<0.000000e+00> : vector<8x8xf32>
    %39 = tpu.matmul %37, %38, %cst_21 {dimension_numbers = #tpu.dot_dimension_numbers<[1], [1], [0], [0], [0, 0, 1, 0], [], []>} : vector<8x8xbf16>, vector<8x8xbf16>, vector<8x8xf32> -> vector<8x8xf32>
    %40 = arith.addf %39, %18 : vector<8x8xf32>
    %cst_22 = arith.constant dense<0xFF800000> : vector<8xf32>
    %41 = vector.multi_reduction <maximumf>, %40, %cst_22 [1] : vector<8x8xf32> to vector<8xf32>
    %42 = vector.shape_cast %41 : vector<8xf32> to vector<8x1xf32>
    %43 = vector.broadcast %42 : vector<8x1xf32> to vector<8x8xf32>
    %44 = arith.subf %40, %43 : vector<8x8xf32>
    %45 = math.exp %44 : vector<8x8xf32>
    %cst_23 = arith.constant dense<0.000000e+00> : vector<8xf32>
    %46 = vector.multi_reduction <add>, %45, %cst_23 [1] : vector<8x8xf32> to vector<8xf32>
    %47 = vector.shape_cast %46 : vector<8xf32> to vector<8x1xf32>
    %48 = arith.truncf %45 : vector<8x8xf32> to vector<8x8xbf16>
    %49 = vector.extract_strided_slice %14 {offsets = [0, 8], sizes = [8, 8], strides = [1, 1]} : vector<8x32xbf16> to vector<8x8xbf16>
    %cst_24 = arith.constant dense<0.000000e+00> : vector<8x8xf32>
    %50 = tpu.matmul %48, %49, %cst_24 {dimension_numbers = #tpu.dot_dimension_numbers<[1], [0], [0], [1], [0, 0, 1, 1], [], []>} : vector<8x8xbf16>, vector<8x8xbf16>, vector<8x8xf32> -> vector<8x8xf32>
    %51 = tpu.reciprocal %47 {approx = true} : vector<8x1xf32> -> vector<8x1xf32>
    %52 = vector.broadcast %51 : vector<8x1xf32> to vector<8x8xf32>
    %53 = arith.mulf %50, %52 : vector<8x8xf32>
    %c0_25 = arith.constant 0 : index
    %c8 = arith.constant 8 : index
    %54 = vector.load %arg17[%c0_25, %c8] : memref<8x32xf32, #tpu.memory_space<vmem>>, vector<8x8xf32>
    tpu.vector_store %arg17[%c0_25, %c8], %53 {strides = array<i32>} : memref<8x32xf32, #tpu.memory_space<vmem>>, vector<8x8xf32>,
    %55 = vector.extract_strided_slice %12 {offsets = [0, 16], sizes = [8, 8], strides = [1, 1]} : vector<8x32xbf16> to vector<8x8xbf16>
    %56 = vector.extract_strided_slice %13 {offsets = [0, 16], sizes = [8, 8], strides = [1, 1]} : vector<8x32xbf16> to vector<8x8xbf16>
    %cst_26 = arith.constant dense<0.000000e+00> : vector<8x8xf32>
    %57 = tpu.matmul %55, %56, %cst_26 {dimension_numbers = #tpu.dot_dimension_numbers<[1], [1], [0], [0], [0, 0, 1, 0], [], []>} : vector<8x8xbf16>, vector<8x8xbf16>, vector<8x8xf32> -> vector<8x8xf32>
    %58 = arith.addf %57, %18 : vector<8x8xf32>
    %cst_27 = arith.constant dense<0xFF800000> : vector<8xf32>
    %59 = vector.multi_reduction <maximumf>, %58, %cst_27 [1] : vector<8x8xf32> to vector<8xf32>
    %60 = vector.shape_cast %59 : vector<8xf32> to vector<8x1xf32>
    %61 = vector.broadcast %60 : vector<8x1xf32> to vector<8x8xf32>
    %62 = arith.subf %58, %61 : vector<8x8xf32>
    %63 = math.exp %62 : vector<8x8xf32>
    %cst_28 = arith.constant dense<0.000000e+00> : vector<8xf32>
    %64 = vector.multi_reduction <add>, %63, %cst_28 [1] : vector<8x8xf32> to vector<8xf32>
    %65 = vector.shape_cast %64 : vector<8xf32> to vector<8x1xf32>
    %66 = arith.truncf %63 : vector<8x8xf32> to vector<8x8xbf16>
    %67 = vector.extract_strided_slice %14 {offsets = [0, 16], sizes = [8, 8], strides = [1, 1]} : vector<8x32xbf16> to vector<8x8xbf16>
    %cst_29 = arith.constant dense<0.000000e+00> : vector<8x8xf32>
    %68 = tpu.matmul %66, %67, %cst_29 {dimension_numbers = #tpu.dot_dimension_numbers<[1], [0], [0], [1], [0, 0, 1, 1], [], []>} : vector<8x8xbf16>, vector<8x8xbf16>, vector<8x8xf32> -> vector<8x8xf32>
    %69 = tpu.reciprocal %65 {approx = true} : vector<8x1xf32> -> vector<8x1xf32>
    %70 = vector.broadcast %69 : vector<8x1xf32> to vector<8x8xf32>
    %71 = arith.mulf %68, %70 : vector<8x8xf32>
    %c0_30 = arith.constant 0 : index
    %c16 = arith.constant 16 : index
    %72 = vector.load %arg17[%c0_30, %c16] : memref<8x32xf32, #tpu.memory_space<vmem>>, vector<8x8xf32>
    tpu.vector_store %arg17[%c0_30, %c16], %71 {strides = array<i32>} : memref<8x32xf32, #tpu.memory_space<vmem>>, vector<8x8xf32>,
    %73 = vector.extract_strided_slice %12 {offsets = [0, 24], sizes = [8, 8], strides = [1, 1]} : vector<8x32xbf16> to vector<8x8xbf16>
    %74 = vector.extract_strided_slice %13 {offsets = [0, 24], sizes = [8, 8], strides = [1, 1]} : vector<8x32xbf16> to vector<8x8xbf16>
    %cst_31 = arith.constant dense<0.000000e+00> : vector<8x8xf32>
    %75 = tpu.matmul %73, %74, %cst_31 {dimension_numbers = #tpu.dot_dimension_numbers<[1], [1], [0], [0], [0, 0, 1, 0], [], []>} : vector<8x8xbf16>, vector<8x8xbf16>, vector<8x8xf32> -> vector<8x8xf32>
    %76 = arith.addf %75, %18 : vector<8x8xf32>
    %cst_32 = arith.constant dense<0xFF800000> : vector<8xf32>
    %77 = vector.multi_reduction <maximumf>, %76, %cst_32 [1] : vector<8x8xf32> to vector<8xf32>
    %78 = vector.shape_cast %77 : vector<8xf32> to vector<8x1xf32>
    %79 = vector.broadcast %78 : vector<8x1xf32> to vector<8x8xf32>
    %80 = arith.subf %76, %79 : vector<8x8xf32>
    %81 = math.exp %80 : vector<8x8xf32>
    %cst_33 = arith.constant dense<0.000000e+00> : vector<8xf32>
    %82 = vector.multi_reduction <add>, %81, %cst_33 [1] : vector<8x8xf32> to vector<8xf32>
    %83 = vector.shape_cast %82 : vector<8xf32> to vector<8x1xf32>
    %84 = arith.truncf %81 : vector<8x8xf32> to vector<8x8xbf16>
    %85 = vector.extract_strided_slice %14 {offsets = [0, 24], sizes = [8, 8], strides = [1, 1]} : vector<8x32xbf16> to vector<8x8xbf16>
    %cst_34 = arith.constant dense<0.000000e+00> : vector<8x8xf32>
    %86 = tpu.matmul %84, %85, %cst_34 {dimension_numbers = #tpu.dot_dimension_numbers<[1], [0], [0], [1], [0, 0, 1, 1], [], []>} : vector<8x8xbf16>, vector<8x8xbf16>, vector<8x8xf32> -> vector<8x8xf32>
    %87 = tpu.reciprocal %83 {approx = true} : vector<8x1xf32> -> vector<8x1xf32>
    %88 = vector.broadcast %87 : vector<8x1xf32> to vector<8x8xf32>
    %89 = arith.mulf %86, %88 : vector<8x8xf32>
    %c0_35 = arith.constant 0 : index
    %c24 = arith.constant 24 : index
    %90 = vector.load %arg17[%c0_35, %c24] : memref<8x32xf32, #tpu.memory_space<vmem>>, vector<8x8xf32>
    tpu.vector_store %arg17[%c0_35, %c24], %89 {strides = array<i32>} : memref<8x32xf32, #tpu.memory_space<vmem>>, vector<8x8xf32>,
    %c0_36 = arith.constant 0 : index
    %c0_37 = arith.constant 0 : index
    %91 = vector.load %arg17[%c0_36, %c0_37] : memref<8x32xf32, #tpu.memory_space<vmem>>, vector<8x32xf32>
    %92 = arith.truncf %91 : vector<8x32xf32> to vector<8x32xbf16>
    %c0_38 = arith.constant 0 : index
    %c0_39 = arith.constant 0 : index
    %93 = vector.load %arg12[%c0_38, %c0_39] : memref<32x32xbf16, #tpu.memory_space<vmem>>, vector<32x32xbf16>
    %cst_40 = arith.constant dense<0.000000e+00> : vector<8x32xf32>
    %94 = tpu.matmul %92, %93, %cst_40 {dimension_numbers = #tpu.dot_dimension_numbers<[1], [0], [0], [1], [0, 0, 1, 1], [], []>} : vector<8x32xbf16>, vector<32x32xbf16>, vector<8x32xf32> -> vector<8x32xf32>
    %c0_41 = arith.constant 0 : index
    %c0_42 = arith.constant 0 : index
    %95 = vector.load %arg13[%c0_41, %c0_42] : memref<1x32xf32, #tpu.memory_space<vmem>>, vector<1x32xf32>
    %96 = vector.broadcast %95 : vector<1x32xf32> to vector<8x32xf32>
    %97 = arith.addf %94, %96 : vector<8x32xf32>
    %c0_43 = arith.constant 0 : index
    %c0_44 = arith.constant 0 : index
    %c0_45 = arith.constant 0 : index
    %98 = vector.load %arg14[%c0_43, %c0_44, %c0_45] : memref<1x8x32xf32, #tpu.memory_space<vmem>>, vector<1x8x32xf32>
    %99 = vector.shape_cast %98 : vector<1x8x32xf32> to vector<8x32xf32>
    %100 = vector.shape_cast %97 : vector<8x32xf32> to vector<1x8x32xf32>
    tpu.vector_store %arg14[%c0_43, %c0_44, %c0_45], %100 {strides = array<i32>} : memref<1x8x32xf32, #tpu.memory_space<vmem>>, vector<1x8x32xf32>,
    return
  }
  func.func @transform_0(%arg0: i32, %arg1: i32) -> (i32, i32, i32) {
    %c0_i32 = arith.constant 0 : i32
    %c0_i32_0 = arith.constant 0 : i32
    %c0_i32_1 = arith.constant 0 : i32
    return %arg0, %c0_i32, %c0_i32_0 : i32, i32, i32
  }
  func.func @transform_1(%arg0: i32, %arg1: i32) -> (i32, i32, i32) {
    %c0_i32 = arith.constant 0 : i32
    %c0_i32_0 = arith.constant 0 : i32
    return %arg0, %arg1, %c0_i32 : i32, i32, i32
  }
  func.func @transform_2(%arg0: i32, %arg1: i32) -> (i32, i32, i32) {
    %c0_i32 = arith.constant 0 : i32
    %c0_i32_0 = arith.constant 0 : i32
    %c0_i32_1 = arith.constant 0 : i32
    return %arg0, %c0_i32, %c0_i32_0 : i32, i32, i32
  }
  func.func @transform_3(%arg0: i32, %arg1: i32) -> (i32, i32, i32) {
    %c0_i32 = arith.constant 0 : i32
    %c0_i32_0 = arith.constant 0 : i32
    %c0_i32_1 = arith.constant 0 : i32
    return %arg0, %c0_i32, %c0_i32_0 : i32, i32, i32
  }
  func.func @transform_4(%arg0: i32, %arg1: i32) -> (i32, i32) {
    %c0_i32 = arith.constant 0 : i32
    %c0_i32_0 = arith.constant 0 : i32
    %c0_i32_1 = arith.constant 0 : i32
    return %c0_i32, %c0_i32_0 : i32, i32
  }
  func.func @transform_5(%arg0: i32, %arg1: i32) -> (i32, i32) {
    %c0_i32 = arith.constant 0 : i32
    %c0_i32_0 = arith.constant 0 : i32
    %c0_i32_1 = arith.constant 0 : i32
    return %c0_i32, %c0_i32_0 : i32, i32
  }
  func.func @transform_6(%arg0: i32, %arg1: i32) -> (i32, i32) {
    %c0_i32 = arith.constant 0 : i32
    %c0_i32_0 = arith.constant 0 : i32
    %c0_i32_1 = arith.constant 0 : i32
    return %c0_i32, %c0_i32_0 : i32, i32
  }
  func.func @transform_7(%arg0: i32, %arg1: i32) -> (i32, i32) {
    %c0_i32 = arith.constant 0 : i32
    %c0_i32_0 = arith.constant 0 : i32
    %c0_i32_1 = arith.constant 0 : i32
    return %c0_i32, %c0_i32_0 : i32, i32
  }
  func.func @transform_8(%arg0: i32, %arg1: i32) -> (i32, i32) {
    %c0_i32 = arith.constant 0 : i32
    %c0_i32_0 = arith.constant 0 : i32
    %c0_i32_1 = arith.constant 0 : i32
    return %c0_i32, %c0_i32_0 : i32, i32
  }
  func.func @transform_9(%arg0: i32, %arg1: i32) -> (i32, i32) {
    %c0_i32 = arith.constant 0 : i32
    %c0_i32_0 = arith.constant 0 : i32
    %c0_i32_1 = arith.constant 0 : i32
    return %c0_i32, %c0_i32_0 : i32, i32
  }
  func.func @transform_10(%arg0: i32, %arg1: i32) -> (i32, i32) {
    %c0_i32 = arith.constant 0 : i32
    %c0_i32_0 = arith.constant 0 : i32
    %c0_i32_1 = arith.constant 0 : i32
    return %c0_i32, %c0_i32_0 : i32, i32
  }
  func.func @transform_11(%arg0: i32, %arg1: i32) -> (i32, i32) {
    %c0_i32 = arith.constant 0 : i32
    %c0_i32_0 = arith.constant 0 : i32
    %c0_i32_1 = arith.constant 0 : i32
    return %c0_i32, %c0_i32_0 : i32, i32
  }
  func.func @transform_12(%arg0: i32, %arg1: i32) -> (i32, i32, i32) {
    %c0_i32 = arith.constant 0 : i32
    %c0_i32_0 = arith.constant 0 : i32
    return %arg0, %arg1, %c0_i32 : i32, i32, i32
  }
}

</mosaic_0001>

<bundles_post_ra>
// kernel: tpu_custom_call.1
= control target key start
LH: loop header
LB: loop body
LE: loop exit
PB: predicated region body
PF: predicated region fallthrough
CT: control target
= control target key end

     0   :  { %s3170_s0 = inlined_call_operand.hbm [shape: f32[2,1,8], index: 0, kind: input, shape index: {}]   ;;  %s3171_s1 = inlined_call_operand.hbm [shape: bf16[2,8,32], index: 1, kind: input, shape index: {}]   ;;  %s3172_s2 = inlined_call_operand.hbm [shape: bf16[2,8,24], index: 2, kind: input, shape index: {}]   ;;  %s3173_s3 = inlined_call_operand.hbm [shape: bf16[2,8,40], index: 3, kind: input, shape index: {}]   ;;  %s3174_s4 = inlined_call_operand.hbm [shape: bf16[32,32], index: 4, kind: input, shape index: {}]   ;;  %s3175_s5 = inlined_call_operand.hbm [shape: f32[1,32], index: 5, kind: input, shape index: {}]   ;;  %s3176_s6 = inlined_call_operand.hbm [shape: bf16[24,32], index: 6, kind: input, shape index: {}]   ;;  %s3177_s7 = inlined_call_operand.hbm [shape: f32[1,32], index: 7, kind: input, shape index: {}]   ;;  %s3178_s8 = inlined_call_operand.hbm [shape: bf16[40,32], index: 8, kind: input, shape index: {}]   ;;  %s3179_s9 = inlined_call_operand.hbm [shape: f32[1,32], index: 9, kind: input, shape index: {}]   ;;  %s3180_s10 = inlined_call_operand.hbm [shape: bf16[32,32], index: 10, kind: input, shape index: {}]   ;;  %s3181_s11 = inlined_call_operand.hbm [shape: f32[1,32], index: 11, kind: input, shape index: {}]   ;;  %s3182_s12 = inlined_call_operand.hbm [shape: f32[2,8,32], index: 12, kind: output, shape index: {}]  }
   0x1   :  { %3208 = sst [smem:[#allocation42_spill]] %s3170_s0 }
   0x2   :  { %3209 = sst [smem:[#allocation43_spill]] %s3171_s1 }
   0x3   :  { %3210 = sst [smem:[#allocation44_spill]] %s3172_s2 }
   0x4   :  { %3211 = sst [smem:[#allocation45_spill]] %s3173_s3 }
   0x5   :  { %3212 = sst [smem:[#allocation46_spill]] %s3174_s4 }
   0x6   :  { %3213 = sst [smem:[#allocation47_spill]] %s3175_s5 }
   0x7   :  { %3214 = sst [smem:[#allocation48_spill]] %s3176_s6 }
   0x8   :  { %3215 = sst [smem:[#allocation49_spill]] %s3177_s7 }
   0x9   :  { %3216 = sst [smem:[#allocation50_spill]] %s3179_s9 }
   0xa   :  { %3217 = sst [smem:[#allocation51_spill]] %s3182_s12 }
   0xb   :  { %17 = vsyncpa [#allocation6], 0 }
   0xc   :  { %19 = vsyncpa [#allocation6 + $0x1], 0 }
   0xd   :  { %20 = vsyncpa [#allocation9], 0 }
   0xe   :  { %22 = vsyncpa [#allocation9 + $0x1], 0 }
   0xf   :  { %23 = vsyncpa [#allocation12], 0 }
  0x10   :  { %25 = vsyncpa [#allocation12 + $0x1], 0 }
  0x11   :  { %26 = vsyncpa [#allocation15], 0 }
  0x12   :  { %27 = vsyncpa [#allocation18], 0 }
  0x13   :  { %28 = vsyncpa [#allocation21], 0 }
  0x14   :  { %29 = vsyncpa [#allocation24], 0 }
  0x15   :  { %30 = vsyncpa [#allocation7], 0 }
  0x16   :  { %32 = vsyncpa [#allocation7 + $0x1], 0  ;;  %s2570_s21 = smov 0   ;;  %s2572_s22 = smov 0  }
  0x17   :  { %s2574_s23 = smov 0   ;;  %s2576_s24 = smov 0  }
  0x18   :  { %s2578_s25 = smov 0   ;;  %s2580_s26 = smov 0  }
  0x19 LB: > { %3218 = sst [smem:[#allocation35_spill]] %s2460_s21  ;;  %s2601_s27 = sadd.s32 4294967295, %s2480_s26   ;;  %s2480_s26 = sphi %s2580_s26, %s38_s26   ;;  %s2476_s25 = sphi %s2578_s25, %s3280_s25   ;;  %s2472_s24 = sphi %s2576_s24, %s3279_s24   ;;  %s2468_s23 = sphi %s2574_s23, %s3275_s23   ;;  %s2464_s22 = sphi %s2572_s22, %s3278_s22   ;;  %s2460_s21 = sphi %s2570_s21, %s3277_s21  }
  0x1a   : > { %3219 = sst [smem:[#allocation36_spill]] %s2468_s23  ;;  %p1658_p0 = scmp.ge.s32.totalorder %s2480_s26, 1 }
  0x1b   : > { %3220 = sst [smem:[#allocation37_spill]] %s2472_s24  ;;  %p3188_p1 = scmp.eq.s32.totalorder %s2601_s27, 0 }
  0x1c   : > { %p357_p2 = scmp.lt.s32.totalorder %s2480_s26, 3  ;;  %s2482_s29 = smov [#allocation13]  }
  0x1d   : > { %s369_s30 = sshll.u32 %s2482_s29, 4  ;;  %s2483_s14 = smov [#allocation14]   ;;  %s2610_s30 = int_to_ptr.vmem [resolvable:$true] %s369_s30 }
  0x1e   : > { %p2606_p3 = pnand %p1658_p0, %p357_p2  ;;  %s383_s15 = sshll.u32 %s2483_s14, 4  ;;  %s2621_s15 = int_to_ptr.vmem [resolvable:$true] %s383_s15 }
  0x1f   : > { %s2484_s16 = smov [#allocation17]   ;;  %s3224_s4 = sld [smem:[#allocation46_spill]] }
  0x20   : > { %s3221_s28 = scalar_select %p2606_p3, 1, 0 }
  0x21   : > { %p1873_p4 = pneg %p2606_p3  ;;  %s2623_s17 = sshll.u32 %s2484_s16, 4  ;;  %s408_s17 = int_to_ptr.vmem [resolvable:$true] %s2623_s17 }
  0x22   : > { %3222 = sst [smem:[#allocation38_spill]] %s3221_s28 }
  0x23   : > { %p2617_p6 = pnand %p1873_p4, %p3188_p1 }
  0x25   : > { %s3223_s13 = scalar_select %p2617_p6, 1, 0 }
  0x26   : > { %s2026_s20 = scalar_lea.hbm %s3224_s4, 256  ;;  %p2633_p8 = pneg %p2617_p6 }
  0x27   : > { %p2027_p7 = scmp.ne.s32.totalorder %s3224_s4, %s2026_s20  ;;  %p2033_p11 = scmp.lt.u32.totalorder %s2026_s20, %s3224_s4 }
  0x28   : > { %s3225_s24 = scalar_select %p2633_p8, 1, 0 }
  0x29   : > { %p2029_p9 = pnand %p2633_p8, %p2027_p7 }
  0x2b   : > { %p2030_p10 = pneg %p2029_p9 }
  0x2d   : > { %p2035_p12 = pnand %p2033_p11, %p2030_p10 }
  0x2f   : > { %2038 = shalt.err (!%p2035_p12)
}
  0x30   : > { %s2039_s12 = scalar_lea.vmem %s2610_s30, 256  ;;  %p2047_p4 = scmp.lt.s32.totalorder %s2610_s30, %s2610_s30 }
  0x31   : > { %p2040_p13 = scmp.ne.s32.totalorder %s2610_s30, %s2039_s12  ;;  %p2048_p5 = scmp.lt.s32.totalorder %s2039_s12, %s2039_s12 }
  0x33   : > { %p2042_p0 = pnand %p2040_p13, %p2633_p8  ;;  %p2049_p7 = por %p2048_p5, %p2047_p4 }
  0x35   : > { %p2043_p2 = pneg %p2042_p0 }
  0x37   : > { %p2050_p9 = pnand %p2049_p7, %p2043_p2 }
  0x39   : > { %2053 = shalt.err (!%p2050_p9)
}
  0x3a   : > { %s3190_s18 = smov 64   ;;  %s3192_s19 = smov 4  }
  0x3b   : > { %1876 = dma.hbm_to_vmem [thread:$0]  (!%p2617_p6), %s3224_s4, 256, %s2610_s30, [#allocation12], %s3190_s18, %s3190_s18, %s3192_s19  }
  0x3c   : > { %s3226_s5 = sld [smem:[#allocation47_spill]] }
  0x42   : > { %s2054_s12 = scalar_lea.hbm %s3226_s5, 16 }
  0x43   : > { %p2055_p5 = scmp.ne.s32.totalorder %s3226_s5, %s2054_s12  ;;  %p2061_p12 = scmp.lt.u32.totalorder %s2054_s12, %s3226_s5 }
  0x45   : > { %p2057_p10 = pnand %p2055_p5, %p2633_p8 }
  0x47   : > { %p2058_p11 = pneg %p2057_p10 }
  0x49   : > { %p2063_p13 = pnand %p2061_p12, %p2058_p11 }
  0x4b   : > { %2066 = shalt.err (!%p2063_p13)
}
  0x4c   : > { %s2067_s30 = scalar_lea.vmem %s2621_s15, 16  ;;  %s2074_s3 = scalar_lea.vmem %s2621_s15, 32 }
  0x4d   : > { %p2068_p0 = scmp.ne.s32.totalorder %s2621_s15, %s2067_s30  ;;  %p2075_p7 = scmp.lt.s32.totalorder %s2621_s15, %s2621_s15 }
  0x4e   : > { %p2076_p9 = scmp.lt.s32.totalorder %s2074_s3, %s2067_s30 }
  0x4f   : > { %p2070_p2 = pnand %p2068_p0, %p2633_p8 }
  0x50   : > { %p2077_p5 = por %p2076_p9, %p2075_p7 }
  0x51   : > { %p2071_p4 = pneg %p2070_p2 }
  0x53   : > { %p2078_p10 = pnand %p2077_p5, %p2071_p4 }
  0x55   : > { %2081 = shalt.err (!%p2078_p10)
}
  0x56   : > { %1879 = dma.hbm_to_vmem [thread:$0]  (!%p2617_p6), %s3226_s5, 16, %s2621_s15, [#allocation15]  }
  0x57   : > { %s3227_s7 = sld [smem:[#allocation49_spill]] }
  0x5d   : > { %s2082_s29 = scalar_lea.hbm %s3227_s7, 16 }
  0x5e   : > { %p2083_p11 = scmp.ne.s32.totalorder %s3227_s7, %s2082_s29  ;;  %p2089_p0 = scmp.lt.u32.totalorder %s2082_s29, %s3227_s7 }
  0x60   : > { %p2085_p12 = pnand %p2083_p11, %p2633_p8 }
  0x62   : > { %p2086_p13 = pneg %p2085_p12 }
  0x64   : > { %p2091_p2 = pnand %p2089_p0, %p2086_p13 }
  0x66   : > { %2094 = shalt.err (!%p2091_p2)
}
  0x67   : > { %s2095_s3 = scalar_lea.vmem %s408_s17, 16  ;;  %s2102_s15 = scalar_lea.vmem %s408_s17, 32 }
  0x68   : > { %p2096_p4 = scmp.ne.s32.totalorder %s408_s17, %s2095_s3  ;;  %p2103_p5 = scmp.lt.s32.totalorder %s408_s17, %s408_s17 }
  0x69   : > { %p2104_p10 = scmp.lt.s32.totalorder %s2102_s15, %s2095_s3 }
  0x6a   : > { %p2098_p7 = pnand %p2096_p4, %p2633_p8 }
  0x6b   : > { %p2105_p1 = por %p2104_p10, %p2103_p5 }
  0x6c   : > { %p2099_p9 = pneg %p2098_p7 }
  0x6e   : > { %p2106_p3 = pnand %p2105_p1, %p2099_p9 }
  0x70   : > { %2109 = shalt.err (!%p2106_p3)
}
  0x71   : > { %1885 = dma.hbm_to_vmem [thread:$0]  (!%p2617_p6), %s3227_s7, 16, %s408_s17, [#allocation18]  }
  0x72   : > { %s2487_s28 = smov [#allocation20]   ;;  %s3228_s9 = sld [smem:[#allocation50_spill]] }
  0x73   : > { %s431_s20 = sshll.u32 %s2487_s28, 4  ;;  %s432_s20 = int_to_ptr.vmem [resolvable:$true] %s431_s20 }
  0x78   : > { %s2110_s16 = scalar_lea.hbm %s3228_s9, 16 }
  0x79   : > { %p2111_p11 = scmp.ne.s32.totalorder %s3228_s9, %s2110_s16  ;;  %p2117_p12 = scmp.lt.u32.totalorder %s2110_s16, %s3228_s9 }
  0x7b   : > { %p2113_p1 = pnand %p2111_p11, %p2633_p8 }
  0x7d   : > { %p2114_p3 = pneg %p2113_p1 }
  0x7f   : > { %p2119_p13 = pnand %p2117_p12, %p2114_p3 }
  0x81   : > { %2122 = shalt.err (!%p2119_p13)
}
  0x82   : > { %s2123_s17 = scalar_lea.vmem %s432_s20, 16  ;;  %s2130_s0 = scalar_lea.vmem %s432_s20, 32 }
  0x83   : > { %p2124_p0 = scmp.ne.s32.totalorder %s432_s20, %s2123_s17  ;;  %p2131_p7 = scmp.lt.s32.totalorder %s432_s20, %s432_s20 }
  0x84   : > { %p2132_p9 = scmp.lt.s32.totalorder %s2130_s0, %s2123_s17 }
  0x85   : > { %p2126_p2 = pnand %p2124_p0, %p2633_p8 }
  0x86   : > { %p2133_p5 = por %p2132_p9, %p2131_p7 }
  0x87   : > { %p2127_p4 = pneg %p2126_p2 }
  0x89   : > { %p2134_p10 = pnand %p2133_p5, %p2127_p4 }
  0x8b   : > { %2137 = shalt.err (!%p2134_p10)
}
  0x8c   : > { %1891 = dma.hbm_to_vmem [thread:$0]  (!%p2617_p6), %s3228_s9, 16, %s432_s20, [#allocation21]  }
  0x8d   : > { %s1657_s29 = sadd.s32 4294967294, %s2480_s26   ;;  %s50_s14 = sadd.s32 1, %s2476_s25 }
  0x8e   : > { %p52_p11 = scmp.ge.s32.totalorder %s50_s14, 2  ;;  %s57_s16 = sadd.s32 1, %s2468_s23 }
  0x8f   : > { %p64_p1 = scmp.ne.s32.totalorder %s2468_s23, %s2464_s22  ;;  %p65_p3 = scmp.eq.s32.totalorder %s2480_s26, 0 }
  0x90   : > { %s3282_s14 = smov (%p52_p11, %s50_s14), 0  ;;  %p70_p13 = scmp.ne.s32.totalorder %s2464_s22, %s2460_s21 }
  0x91   : > { %3229 = sst [smem:[#allocation39_spill]] %s3282_s14  ;;  %p2726_p12 = por %p65_p3, %p64_p1 }
  0x92   : > { %s54_s20 = ssub.s32 %s2476_s25, %s3282_s14  ;;  %p344_p0 = scmp.eq.s32.totalorder %s2601_s27, 1 }
  0x93   : > { %p55_p2 = scmp.eq.s32.totalorder %s54_s20, 0  ;;  %p3231_p4 = scmp.eq.s32.totalorder %s2601_s27, 0 }
  0x94   : > { %p2741_p9 = por %p344_p0, %p64_p1  ;;  %p350_p5 = scmp.eq.s32.totalorder %s1657_s29, 1 }
  0x95   : > { %p2737_p7 = por %p3231_p4, %p70_p13  ;;  %p1923_p11 = scmp.lt.s32.totalorder %s2480_s26, 2 }
  0x96   : > { %s3233_s3 = scalar_select %p2741_p9, 1, 0 }
  0x97   : > { %s3232_s30 = scalar_select %p2737_p7, 1, 0 }
  0x98   : > { %s2746_s15 = scalar_select %p55_p2, %s2468_s23, %s57_s16  }
  0x99   : > { %p2748_p10 = por %p350_p5, %p70_p13  ;;  %s2754_s0 = sand.u32 1, %s2468_s23  }
  0x9a   : > { %3234 = sst [smem:[#allocation40_spill]] %s2746_s15  ;;  %p2759_p3 = pnand %p1923_p11, %p2726_p12 }
  0x9b   : > { %s3235_s17 = scalar_select %p2748_p10, 1, 0 }
  0x9c   : > { %s3237_s28 = scalar_select %p2759_p3, 1, 0 }
  0x9d   : > { %3236 = sst [smem:[#allocation41_spill]] %s3235_s17  ;;  %s2764_s20 = sshll.u32 %s2754_s0, 2 }
  0x9e   : > { %s2767_s29 = sshll.u32 %s2476_s25, 6  ;;  %s3238_s1 = sld [smem:[#allocation43_spill]] }
  0x9f   : > { %s487_s12 = scalar_lea.vmem [#allocation8], %s2764_s20  ;;  %s3239_s4 = sand.u32 1, %s2480_s26  }
  0xa0   : > { %s495_s2 = sshll.u32 %s487_s12, 4  ;;  %s2780_s5 = scalar_lea.sflag [#allocation9], %s3239_s4  ;;  %s2776_s2 = int_to_ptr.vmem [resolvable:$true] %s495_s2 }
  0xa1   : > { %p2786_p12 = pneg %p2759_p3 }
  0xa3   : > { %s3240_s9 = scalar_select %p2786_p12, 1, 0 }
  0xa4   : > { %s2773_s19 = scalar_lea.hbm %s3238_s1, %s2767_s29  ;;  %s2143_s12 = scalar_lea.hbm %s3238_s1, 128 }
  0xa5   : > { %s2138_s7 = scalar_lea.hbm %s2773_s19, 64  ;;  %p2144_p2 = scmp.lt.u32.totalorder %s2773_s19, %s3238_s1 }
  0xa6   : > { %p2139_p1 = scmp.ne.s32.totalorder %s2773_s19, %s2138_s7  ;;  %p2145_p4 = scmp.lt.u32.totalorder %s2143_s12, %s2138_s7 }
  0xa7   : > { %p2147_p11 = scmp.lt.u32.totalorder %s2138_s7, %s2773_s19 }
  0xa8   : > { %p2141_p13 = pnand %p2786_p12, %p2139_p1  ;;  %p2146_p5 = por %p2145_p4, %p2144_p2 }
  0xaa   : > { %p2142_p0 = pneg %p2141_p13  ;;  %p2148_p10 = por %p2147_p11, %p2146_p5 }
  0xac   : > { %p2149_p9 = pnand %p2148_p10, %p2142_p0 }
  0xae   : > { %2152 = shalt.err (!%p2149_p9)
}
  0xaf   : > { %s2153_s4 = scalar_lea.vmem %s2776_s2, 64  ;;  %s2488_s18 = smov [#allocation8]  }
  0xb0   : > { %p2154_p1 = scmp.ne.s32.totalorder %s2776_s2, %s2153_s4  ;;  %s2158_s16 = sshll.u32 %s2488_s18, 4  ;;  %s2159_s16 = int_to_ptr.vmem [resolvable:$false] %s2158_s16 }
  0xb1   : > { %s2160_s14 = scalar_lea.vmem %s2159_s16, 128  ;;  %p2161_p6 = scmp.lt.s32.totalorder %s2776_s2, %s2159_s16 }
  0xb2   : > { %p2156_p13 = pnand %p2154_p1, %p2786_p12  ;;  %p2162_p8 = scmp.lt.s32.totalorder %s2160_s14, %s2153_s4 }
  0xb4   : > { %p2157_p7 = pneg %p2156_p13  ;;  %p2163_p2 = por %p2162_p8, %p2161_p6 }
  0xb6   : > { %p2164_p4 = pnand %p2163_p2, %p2157_p7 }
  0xb8   : > { %2167 = shalt.err (!%p2164_p4)
}
  0xb9   : > { %1904 = dma.hbm_to_vmem [thread:$0]  (!%p2759_p3), %s2773_s19, 64, %s2776_s2, %s2780_s5  }
  0xba   : > { %s2489_s7 = smov [#allocation16]   ;;  %s2490_s12 = smov [#allocation19]  }
  0xbb   : > { %s393_s15 = sshll.u32 %s2489_s7, 4  ;;  %s417_s1 = sshll.u32 %s2490_s12, 4  ;;  %s394_s15 = int_to_ptr.vmem [resolvable:$true] %s393_s15  ;;  %s2810_s1 = int_to_ptr.vmem [resolvable:$true] %s417_s1 }
  0xbc   : > { %s3241_s6 = sld [smem:[#allocation48_spill]]  ;;  %p3242_p8 = scmp.ne.s32.totalorder %s3225_s24, 0 }
  0xc2   : > { %s2168_s4 = scalar_lea.hbm %s3241_s6, 192 }
  0xc3   : > { %p2169_p6 = scmp.ne.s32.totalorder %s3241_s6, %s2168_s4  ;;  %p2175_p10 = scmp.lt.u32.totalorder %s2168_s4, %s3241_s6 }
  0xc5   : > { %p2171_p7 = pnand %p2169_p6, %p3242_p8 }
  0xc7   : > { %p2172_p9 = pneg %p2171_p7 }
  0xc9   : > { %p2177_p0 = pnand %p2175_p10, %p2172_p9 }
  0xcb   : > { %2180 = shalt.err (!%p2177_p0)
}
  0xcc   : > { %s2181_s2 = scalar_lea.vmem %s394_s15, 192  ;;  %p2189_p13 = scmp.lt.s32.totalorder %s394_s15, %s394_s15 }
  0xcd   : > { %p2182_p5 = scmp.ne.s32.totalorder %s394_s15, %s2181_s2  ;;  %p2190_p2 = scmp.lt.s32.totalorder %s2181_s2, %s2181_s2 }
  0xcf   : > { %p2184_p11 = pnand %p2182_p5, %p3242_p8  ;;  %p2191_p4 = por %p2190_p2, %p2189_p13 }
  0xd1   : > { %p2185_p1 = pneg %p2184_p11 }
  0xd3   : > { %p2192_p3 = pnand %p2191_p4, %p2185_p1 }
  0xd5   : > { %2195 = shalt.err (!%p2192_p3)
}
  0xd6   : > { %p3243_p6 = scmp.ne.s32.totalorder %s3223_s13, 0  ;;  %s3244_s23 = smov 4  }
  0xd7   : > { %s3245_s7 = smov 64   ;;  %s2196_s4 = scalar_lea.hbm %s3178_s8, 320 }
  0xd8   : > { %1882 = dma.hbm_to_vmem [thread:$0]  (!%p3243_p6), %s3241_s6, 192, %s394_s15, [#allocation15], %s3245_s7, %s3245_s7, %s3244_s23  }
  0xd9   : > { %p2197_p7 = scmp.ne.s32.totalorder %s3178_s8, %s2196_s4  ;;  %p2203_p10 = scmp.lt.u32.totalorder %s2196_s4, %s3178_s8 }
  0xdb   : > { %p2199_p3 = pnand %p2197_p7, %p3242_p8 }
  0xdd   : > { %p2200_p9 = pneg %p2199_p3 }
  0xdf   : > { %p2205_p0 = pnand %p2203_p10, %p2200_p9 }
  0xe1   : > { %2208 = shalt.err (!%p2205_p0)
}
  0xe2   : > { %s2209_s15 = scalar_lea.vmem %s2810_s1, 320  ;;  %p2217_p13 = scmp.lt.s32.totalorder %s2810_s1, %s2810_s1 }
  0xe3   : > { %p2210_p5 = scmp.ne.s32.totalorder %s2810_s1, %s2209_s15  ;;  %p2218_p2 = scmp.lt.s32.totalorder %s2209_s15, %s2209_s15 }
  0xe5   : > { %p2212_p11 = pnand %p2210_p5, %p3242_p8  ;;  %p2219_p4 = por %p2218_p2, %p2217_p13 }
  0xe7   : > { %p2213_p1 = pneg %p2212_p11 }
  0xe9   : > { %p2220_p7 = pnand %p2219_p4, %p2213_p1 }
  0xeb   : > { %2223 = shalt.err (!%p2220_p7)
}
  0xec   : > { %1888 = dma.hbm_to_vmem [thread:$0]  (!%p3243_p6), %s3178_s8, 320, %s2810_s1, [#allocation18], %s3245_s7, %s3245_s7, %s3244_s23  }
  0xed   : > { %s2491_s12 = smov [#allocation22]   ;;  %s2492_s16 = smov [#allocation23]  }
  0xee   : > { %s441_s18 = sshll.u32 %s2491_s12, 4  ;;  %s455_s4 = sshll.u32 %s2492_s16, 4  ;;  %s442_s18 = int_to_ptr.vmem [resolvable:$true] %s441_s18  ;;  %s2859_s4 = int_to_ptr.vmem [resolvable:$true] %s455_s4 }
  0xef   : > { %s2224_s2 = scalar_lea.hbm %s3180_s10, 256 }
  0xf0   : > { %p2225_p3 = scmp.ne.s32.totalorder %s3180_s10, %s2224_s2  ;;  %p2231_p0 = scmp.lt.u32.totalorder %s2224_s2, %s3180_s10 }
  0xf2   : > { %p2227_p9 = pnand %p2225_p3, %p3242_p8 }
  0xf4   : > { %p2228_p10 = pneg %p2227_p9 }
  0xf6   : > { %p2233_p5 = pnand %p2231_p0, %p2228_p10 }
  0xf8   : > { %2236 = shalt.err (!%p2233_p5)
}
  0xf9   : > { %s2237_s17 = scalar_lea.vmem %s442_s18, 256  ;;  %p2245_p2 = scmp.lt.s32.totalorder %s442_s18, %s442_s18 }
  0xfa   : > { %p2238_p11 = scmp.ne.s32.totalorder %s442_s18, %s2237_s17  ;;  %p2246_p4 = scmp.lt.s32.totalorder %s2237_s17, %s2237_s17 }
  0xfc   : > { %p2240_p1 = pnand %p2238_p11, %p3242_p8  ;;  %p2247_p7 = por %p2246_p4, %p2245_p2 }
  0xfe   : > { %p2241_p13 = pneg %p2240_p1 }
 0x100   : > { %p2248_p12 = pnand %p2247_p7, %p2241_p13 }
 0x102   : > { %2251 = shalt.err (!%p2248_p12)
}
 0x103   : > { %1894 = dma.hbm_to_vmem [thread:$0]  (!%p3243_p6), %s3180_s10, 256, %s442_s18, [#allocation21], %s3245_s7, %s3245_s7, %s3244_s23  }
 0x104   : > { %s2252_s19 = scalar_lea.hbm %s3181_s11, 16 }
 0x105   : > { %p2253_p3 = scmp.ne.s32.totalorder %s3181_s11, %s2252_s19  ;;  %p2259_p10 = scmp.lt.u32.totalorder %s2252_s19, %s3181_s11 }
 0x107   : > { %p2255_p12 = pnand %p2253_p3, %p3242_p8 }
 0x109   : > { %p2256_p9 = pneg %p2255_p12 }
 0x10b   : > { %p2261_p0 = pnand %p2259_p10, %p2256_p9 }
 0x10d   : > { %2264 = shalt.err (!%p2261_p0)
}
 0x10e   : > { %s2265_s23 = scalar_lea.vmem %s2859_s4, 16  ;;  %s2272_s7 = scalar_lea.vmem %s2859_s4, 32 }
 0x10f   : > { %p2266_p5 = scmp.ne.s32.totalorder %s2859_s4, %s2265_s23  ;;  %p2273_p13 = scmp.lt.s32.totalorder %s2859_s4, %s2859_s4 }
 0x110   : > { %p2274_p2 = scmp.lt.s32.totalorder %s2272_s7, %s2265_s23 }
 0x111   : > { %p2268_p11 = pnand %p2266_p5, %p3242_p8 }
 0x112   : > { %p2275_p4 = por %p2274_p2, %p2273_p13 }
 0x113   : > { %p2269_p1 = pneg %p2268_p11 }
 0x115   : > { %p2276_p7 = pnand %p2275_p4, %p2269_p1 }
 0x117   : > { %2279 = shalt.err (!%p2276_p7)
}
 0x118   : > { %1897 = dma.hbm_to_vmem [thread:$0]  (!%p3243_p6), %s3181_s11, 16, %s2859_s4, [#allocation24]  }
 0x119   : > { %s1668_s24 = sshll.u32 %s2476_s25, 4  ;;  %s469_s6 = scalar_lea.vmem [#allocation5], %s2754_s0 }
 0x11a   : > { %s476_s12 = sshll.u32 %s469_s6, 4  ;;  %s3246_s19 = sld [smem:[#allocation42_spill]]  ;;  %s477_s12 = int_to_ptr.vmem [resolvable:$true] %s476_s12 }
 0x11b   : > { %s467_s13 = scalar_lea.sflag [#allocation6], %s2754_s0  ;;  %p3247_p3 = scmp.ne.s32.totalorder %s3240_s9, 0 }
 0x120   : > { %s2911_s2 = scalar_lea.hbm %s3246_s19, %s1668_s24  ;;  %s2285_s1 = scalar_lea.hbm %s3246_s19, 32 }
 0x121   : > { %s2280_s15 = scalar_lea.hbm %s2911_s2, 16  ;;  %p2286_p6 = scmp.lt.u32.totalorder %s2911_s2, %s3246_s19 }
 0x122   : > { %p2281_p8 = scmp.ne.s32.totalorder %s2911_s2, %s2280_s15  ;;  %p2287_p10 = scmp.lt.u32.totalorder %s2285_s1, %s2280_s15 }
 0x123   : > { %p2289_p5 = scmp.lt.u32.totalorder %s2280_s15, %s2911_s2 }
 0x124   : > { %p2283_p12 = pnand %p2281_p8, %p3247_p3  ;;  %p2288_p0 = por %p2287_p10, %p2286_p6 }
 0x126   : > { %p2284_p9 = pneg %p2283_p12  ;;  %p2290_p11 = por %p2289_p5, %p2288_p0 }
 0x128   : > { %p2291_p1 = pnand %p2290_p11, %p2284_p9 }
 0x12a   : > { %2294 = shalt.err (!%p2291_p1)
}
 0x12b   : > { %s2295_s0 = scalar_lea.vmem %s477_s12, 16  ;;  %s2493_s18 = smov [#allocation5]  }
 0x12c   : > { %p2296_p13 = scmp.ne.s32.totalorder %s477_s12, %s2295_s0  ;;  %s2300_s17 = sshll.u32 %s2493_s18, 4  ;;  %s2301_s17 = int_to_ptr.vmem [resolvable:$false] %s2300_s17 }
 0x12d   : > { %s2302_s24 = scalar_lea.vmem %s2301_s17, 32  ;;  %p2303_p7 = scmp.lt.s32.totalorder %s477_s12, %s2301_s17 }
 0x12e   : > { %p2298_p2 = pnand %p2296_p13, %p3247_p3  ;;  %p2304_p8 = scmp.lt.s32.totalorder %s2302_s24, %s2295_s0 }
 0x130   : > { %p2299_p4 = pneg %p2298_p2  ;;  %p2305_p12 = por %p2304_p8, %p2303_p7 }
 0x132   : > { %p2306_p6 = pnand %p2305_p12, %p2299_p4 }
 0x134   : > { %2309 = shalt.err (!%p2306_p6)
}
 0x135   : > { %p3248_p10 = scmp.ne.s32.totalorder %s3237_s28, 0  ;;  %s3249_s14 = sld [smem:[#allocation44_spill]] }
 0x136   : > { %s506_s4 = scalar_lea.vmem [#allocation10], %s2764_s20  ;;  %s3250_s7 = sld [smem:[#allocation45_spill]] }
 0x137   : > { %1901 = dma.hbm_to_vmem [thread:$0]  (!%p3248_p10), %s2911_s2, 16, %s477_s12, %s467_s13  }
 0x138   : > { %s513_s21 = sshll.u32 %s506_s4, 4  ;;  %s514_s21 = int_to_ptr.vmem [resolvable:$true] %s513_s21 }
 0x13b   : > { %s2935_s15 = scalar_lea.hbm %s3249_s14, %s2767_s29  ;;  %s2315_s13 = scalar_lea.hbm %s3249_s14, 128 }
 0x13c   : > { %s2942_s0 = scalar_lea.hbm %s3250_s7, %s2767_s29  ;;  %s2310_s18 = scalar_lea.hbm %s2935_s15, 64 }
 0x13d   : > { %p2311_p9 = scmp.ne.s32.totalorder %s2935_s15, %s2310_s18  ;;  %p2316_p11 = scmp.lt.u32.totalorder %s2935_s15, %s3249_s14 }
 0x13e   : > { %p2317_p1 = scmp.lt.u32.totalorder %s2315_s13, %s2310_s18  ;;  %p2319_p2 = scmp.lt.u32.totalorder %s2310_s18, %s2935_s15 }
 0x13f   : > { %p2313_p0 = pnand %p2311_p9, %p3247_p3 }
 0x140   : > { %p2318_p13 = por %p2317_p1, %p2316_p11 }
 0x141   : > { %p2314_p5 = pneg %p2313_p0 }
 0x142   : > { %p2320_p4 = por %p2319_p2, %p2318_p13 }
 0x144   : > { %p2321_p7 = pnand %p2320_p4, %p2314_p5 }
 0x146   : > { %2324 = shalt.err (!%p2321_p7)
}
 0x147   : > { %s2325_s29 = scalar_lea.vmem %s514_s21, 64  ;;  %s2494_s6 = smov [#allocation10]  }
 0x148   : > { %p2326_p8 = scmp.ne.s32.totalorder %s514_s21, %s2325_s29  ;;  %s2330_s16 = sshll.u32 %s2494_s6, 4  ;;  %s2331_s16 = int_to_ptr.vmem [resolvable:$false] %s2330_s16 }
 0x149   : > { %s2332_s4 = scalar_lea.vmem %s2331_s16, 128  ;;  %p2333_p9 = scmp.lt.s32.totalorder %s514_s21, %s2331_s16 }
 0x14a   : > { %p2328_p12 = pnand %p2326_p8, %p3247_p3  ;;  %p2334_p0 = scmp.lt.s32.totalorder %s2332_s4, %s2325_s29 }
 0x14c   : > { %p2329_p6 = pneg %p2328_p12  ;;  %p2335_p10 = por %p2334_p0, %p2333_p9 }
 0x14e   : > { %p2336_p1 = pnand %p2335_p10, %p2329_p6 }
 0x150   : > { %2339 = shalt.err (!%p2336_p1)
}
 0x151   : > { %p3251_p11 = scmp.ne.s32.totalorder %s3237_s28, 0  ;;  %s524_s1 = scalar_lea.vmem [#allocation11], %s2764_s20 }
 0x152   : > { %s531_s23 = sshll.u32 %s524_s1, 4  ;;  %s3252_s18 = sand.u32 1, %s2480_s26   ;;  %s532_s23 = int_to_ptr.vmem [resolvable:$true] %s531_s23 }
 0x153   : > { %1907 = dma.hbm_to_vmem [thread:$0]  (!%p3251_p11), %s2935_s15, 64, %s514_s21, %s2780_s5  }
 0x154   : > { %s521_s12 = scalar_lea.sflag [#allocation12], %s3252_s18  ;;  %s2340_s2 = scalar_lea.hbm %s2942_s0, 64 }
 0x155   : > { %p2341_p10 = scmp.ne.s32.totalorder %s2942_s0, %s2340_s2  ;;  %s2345_s24 = scalar_lea.hbm %s3250_s7, 128 }
 0x156   : > { %p2346_p2 = scmp.lt.u32.totalorder %s2942_s0, %s3250_s7  ;;  %p2347_p4 = scmp.lt.u32.totalorder %s2345_s24, %s2340_s2 }
 0x157   : > { %p2343_p5 = pnand %p2341_p10, %p3247_p3  ;;  %p2349_p8 = scmp.lt.u32.totalorder %s2340_s2, %s2942_s0 }
 0x158   : > { %p2348_p7 = por %p2347_p4, %p2346_p2 }
 0x159   : > { %p2344_p13 = pneg %p2343_p5 }
 0x15a   : > { %p2350_p12 = por %p2349_p8, %p2348_p7 }
 0x15c   : > { %p2351_p6 = pnand %p2350_p12, %p2344_p13 }
 0x15e   : > { %2354 = shalt.err (!%p2351_p6)
}
 0x15f   : > { %s2355_s5 = scalar_lea.vmem %s532_s23, 64  ;;  %s2495_s20 = smov [#allocation11]  }
 0x160   : > { %p2356_p9 = scmp.ne.s32.totalorder %s532_s23, %s2355_s5  ;;  %s2360_s15 = sshll.u32 %s2495_s20, 4  ;;  %s2361_s15 = int_to_ptr.vmem [resolvable:$false] %s2360_s15 }
 0x161   : > { %s2362_s21 = scalar_lea.vmem %s2361_s15, 128  ;;  %p2363_p10 = scmp.lt.s32.totalorder %s532_s23, %s2361_s15 }
 0x162   : > { %p2358_p0 = pnand %p2356_p9, %p3247_p3  ;;  %p2364_p5 = scmp.lt.s32.totalorder %s2362_s21, %s2355_s5 }
 0x164   : > { %p2359_p1 = pneg %p2358_p0  ;;  %p2365_p11 = por %p2364_p5, %p2363_p10 }
 0x166   : > { %p2366_p2 = pnand %p2365_p11, %p2359_p1 }
 0x168   : > { %2369 = shalt.err (!%p2366_p2)
}
 0x169   : > { %p3253_p4 = scmp.ne.s32.totalorder %s3237_s28, 0  ;;  %s3254_s16 = sld [smem:[#allocation38_spill]] }
 0x16b   : > { %1910 = dma.hbm_to_vmem [thread:$0]  (!%p3253_p4), %s2942_s0, 64, %s532_s23, %s521_s12  }
 0x16f   : > { %p3255_p13 = scmp.ne.s32.totalorder %s3254_s16, 0 }
 0x170   : > { %s2985_s9 = sand.u32 (!%p3255_p13), 1, %s2464_s22   ;;  %p3256_p3 = scmp.ne.s32.totalorder (!%p3255_p13), %s3232_s30, 0 }
 0x171   : > { %540 = sbr.rel (%p3255_p13) target bundleno = 1715 (0x6b3), region = 68  ;;  %s543_s4 = scalar_lea.sflag (!%p3255_p13), [#allocation6], %s2985_s9 }
 0x172   : > { %s545_s1 = scalar_lea.vmem (!%p3255_p13), [#allocation5], %s2985_s9 }
 0x178   : > { %2423 = dma.done.wait (%p3256_p3), %s543_s4, 16  }
 0x179   : > { %2425 = vsyncadd (%p3256_p3), %s543_s4, 4294967280  ;;  %s550_s28 = sand.u32 1, %s2601_s27   ;;  %s2995_s0 = sshll.u32 %s2985_s9, 2 }
 0x17a   : > { %s551_s23 = scalar_lea.sflag [#allocation9], %s550_s28  ;;  %s554_s18 = scalar_lea.vmem [#allocation8], %s2995_s0 }
 0x17b   : > { %2427 = dma.done.wait (%p3256_p3), %s551_s23, 128  }
 0x17c   : > { %2429 = vsyncadd (%p3256_p3), %s551_s23, 4294967168  ;;  %s563_s12 = scalar_lea.vmem [#allocation10], %s2995_s0  ;;  %s569_s2 = scalar_lea.sflag [#allocation12], %s550_s28 }
 0x17d   : > { %s572_s13 = scalar_lea.vmem [#allocation11], %s2995_s0 }
 0x17e   : > { %2431 = dma.done.wait (%p3256_p3), %s569_s2, 64  }
 0x17f   : > { %2433 = vsyncadd (%p3256_p3), %s569_s2, 4294967232  ;;  %p3257_p11 = scmp.eq.s32.totalorder %s2601_s27, 0 }
 0x181   : > { %2435 = dma.done.wait (%p3257_p11), [#allocation12], 256   ;;  %p3258_p7 = pmov %p3257_p11 }
 0x183   : > { %2437 = vsyncadd (%p3258_p7), [#allocation12], 4294967040  ;;  %p3259_p8 = pmov %p3258_p7 }
 0x184   : > { %p3260_p12 = pmov %p3258_p7 }
 0x185   : > { %2439 = dma.done.wait (%p3259_p8), [#allocation15], 208  }
 0x186   : > { %2441 = vsyncadd (%p3260_p12), [#allocation15], 4294967088  ;;  %p3261_p6 = pmov %p3258_p7 }
 0x188   : > { %2443 = dma.done.wait (%p3261_p6), [#allocation18], 336   ;;  %p3262_p9 = pmov %p3261_p6 }
 0x189   : > { %p3263_p0 = pmov %p3261_p6 }
 0x18a   : > { %2445 = vsyncadd (%p3262_p9), [#allocation18], 4294966960 }
 0x18b   : > { %2447 = dma.done.wait (%p3263_p0), [#allocation21], 272   ;;  %p3264_p1 = pmov %p3263_p0 }
 0x18c   : > { %p3265_p10 = pmov %p3263_p0 }
 0x18d   : > { %2449 = vsyncadd (%p3264_p1), [#allocation21], 4294967024 }
 0x18e   : > { %2451 = dma.done.wait (%p3265_p10), [#allocation24], 16   ;;  %p3266_p5 = pmov %p3263_p0 }
 0x18f   : > { %v2496_v0 = vmov 0.0   ;;  %vm2497_vm0 = vmmov 0   ;;  %v1999_v1 = vld [vmem:[#allocation16] sm:$0xff]   ;;  %vm689_vm1 = vcmask 1043456   ;;  %v2000_v2 = vld [vmem:[#allocation16 + $0x8] ss:$0 sps:$4 sm:$0xff]  }
 0x190   : > { %2453 = vsyncadd (%p3266_p5), [#allocation24], 4294967280  ;;  %1749 = vmatprep.subr.bf16.mxu0 %v2496_v0  ;;  %1753 = vmatprep.mubr.msk.bf16.mxu0 %vm2497_vm0, %v2496_v0  ;;  %v691_v3 = vsel %vm689_vm1, %v2000_v2, 0  ;;  %v664_v4 = vld [vmem:[%s563_s12] sm:$0xf]  ;;  %vm685_vm2 = vcmask 195584  }
 0x191   : > { %1757 = vmatprep.subr.bf16.mxu1 %v2496_v0  ;;  %1763 = vmatprep.mubr.msk.bf16.mxu1 %vm2497_vm0, %v2496_v0  ;;  %v2001_v5 = vld [vmem:[#allocation13] sm:$0xff]   ;;  %v2002_v7 = vld [vmem:[#allocation13 + $0x8] sm:$0xff]   ;;  %vm836_vm3 = vcmask 261120   ;;  %v2005_v10 = vld [vmem:[#allocation19 + $0x10] ss:$0 sps:$4 sm:$0xff]   ;;  %vm763_vm4 = vcmask 326656  }
 0x192   : > { %1750 = vmatpush3.bf16.msra.mxu0 %v1999_v1  ;;  %v2003_v6 = vld [vmem:[#allocation19] sm:$0xff]   ;;  %v812_v8 = vld [vmem:[%s554_s18] sm:$0xf]  ;;  %v768_v11 = vsel %vm689_vm1, %v2005_v10, 0  ;;  %v665_v12 = vld [vmem:[%s572_s13] sm:$0xf] }
 0x193   : > { %1751 = vmatprep.subr.bf16.mxu0 %v2496_v0  ;;  %1758 = vmatpush3.bf16.msra.mxu1 %v2003_v6  ;;  %v2004_v9 = vld [vmem:[#allocation19 + $0x8] sm:$0xff]   ;;  %v1688_v13 = vld [vmem:[#allocation17] ss:$0 sm:$0xff]  ;;  %vm734_vm5 = vcmask 257024   ;;  %v1697_v20 = vld [vmem:[#allocation14] ss:$0 sm:$0xff] }
 0x194   : > { %1759 = vmatprep.subr.bf16.mxu1 %v2496_v0  ;;  %vm891_vm6 = vcmask 64512   ;;  %s2498_s27 = smov 112   ;;  %s2499_s30 = smov 120   ;;  %v1692_v31 = vld [vmem:[#allocation20] ss:$0 sm:$0xff]  ;;  %vm1119_vm7 = vcmask 130112  }
 0x195   : > { %s2500_s17 = smov 104   ;;  %v1701_v49 = vld [vmem:[%s545_s1] ss:$0 sm:$0xff]  ;;  %s2501_s24 = smov 8   ;;  %vm1235_vm8 = vcmask 195712   ;;  %vm1351_vm9 = vcmask 261312  }
 0x196   : > { %1752 = vmatpush3.bf16.msra.mxu0 %v691_v3  ;;  %s2502_s29 = smov 16   ;;  %s2503_s6 = smov 24  }
 0x197   : > { %1767 = vmatprep.subr.bf16.mxu0 %v2496_v0  ;;  %1760 = vmatpush3.bf16.msra.mxu1 %v2004_v9  ;;  %s3267_s5 = sld [smem:[#allocation37_spill]]  ;;  %s1687_s20 = sshll.u32 %s2985_s9, 3 }
 0x198   : > { %1761 = vmatprep.subr.bf16.mxu1 %v2496_v0  ;;  %s658_s21 = scalar_lea.vmem [#allocation25], %s1687_s20  ;;  %s3268_s28 = sld [smem:[#allocation51_spill]] }
 0x199   : > { %1754 = vmatmul.mubr.msk.bf16.vlgmr.msra.gmra.mrb[0].mxu0 %vm685_vm2, %v664_v4  ;;  %s1437_s16 = sshll.u32 %s658_s21, 4  ;;  %s1423_s23 = scalar_lea.sflag [#allocation7], %s2985_s9  ;;  %s3122_s16 = int_to_ptr.vmem [resolvable:$true] %s1437_s16 }
 0x19a   : > { %1768 = vmatpush3.bf16.msra.mxu0 %v2001_v5  ;;  %1771 = vmatprep.mubr.msk.bf16.mxu0 %vm2497_vm0, %v2496_v0  ;;  %s2370_s18 = scalar_lea.vmem %s3122_s16, 128  ;;  %p3269_p4 = scmp.ne.s32.totalorder %s3233_s3, 0 }
 0x19b   : > { %1769 = vmatprep.subr.bf16.mxu0 %v2496_v0  ;;  %1762 = vmatpush3.bf16.msra.mxu1 %v768_v11  ;;  %p2371_p2 = scmp.ne.s32.totalorder %s3122_s16, %s2370_s18  ;;  %s2504_s12 = smov [#allocation25]  }
 0x19c   : > { %1775 = vmatprep.subr.bf16.mxu1 %v2496_v0  ;;  %s2374_s2 = sshll.u32 %s2504_s12, 4  ;;  %s2375_s2 = int_to_ptr.vmem [resolvable:$false] %s2374_s2 }
 0x19d   : > { %s1717_s15 = sshll.u32 %s3267_s5, 7  ;;  %p2372_p13 = pnand %p2371_p2, %p3269_p4 }
 0x19e   : > { %1770 = vmatpush3.bf16.msra.mxu0 %v2002_v7  ;;  %1764 = vmatmul.mubr.msk.bf16.vlgmr.msra.gmra.mrb[0].mxu1 %vm763_vm4, %v665_v12  ;;  %s3120_s0 = scalar_lea.hbm %s3268_s28, %s1717_s15  ;;  %s2376_s13 = scalar_lea.vmem %s2375_s2, 256 }
 0x19f   : > { %1781 = vmatprep.subr.bf16.mxu0 %v2496_v0  ;;  %1777 = vmatprep.mubr.msk.bf16.mxu1 %vm2497_vm0, %v2496_v0  ;;  %p2373_p3 = pneg %p2372_p13  ;;  %p2377_p11 = scmp.lt.s32.totalorder %s3122_s16, %s2375_s2 }
 0x1a0   : > { %p2378_p7 = scmp.lt.s32.totalorder %s2376_s13, %s2370_s18 }
 0x1a1   : > { %1772 = vmatmul.mubr.msk.bf16.vlgmr.msra.gmra.mrb[4].mxu0 %vm836_vm3, %v812_v8 }
 0x1a2   : > { %1783 = vmatprep.mubr.msk.bf16.mxu0 %vm2497_vm0, %v2496_v0  ;;  %p2379_p8 = por %p2378_p7, %p2377_p11 }
 0x1a4   : > { %p2380_p12 = pnand %p2379_p8, %p2373_p3 }
 0x26c   : > { %v727_v14 = vpop.f32.mrb[0].mxu0 }
 0x26d   : > { %v728_v15 = vadd.f32 %v1688_v13, %v727_v14  ;;  %v1755_v16 = vpop.f32.mrb[1].mxu0 }
 0x26e   : > { %v730_v17 = vpop.f32.mrb[2].mxu0 }
 0x26f   : > { %v733_v18 = vpack.c.bf16 %v728_v15, %v728_v15  ;;  %v1756_v19 = vpop.f32.mrb[3].mxu0 }
 0x271   : > { %735 = vst.msk [vmem:[#allocation2] sm:$0xf] %vm734_vm5, %v733_v18  ;;  %v804_v32 = vpop.f32.mrb[0].mxu1 }
 0x272   : > { %v805_v33 = vadd.f32 %v1692_v31, %v804_v32  ;;  %v1765_v34 = vpop.f32.mrb[1].mxu1 }
 0x273   : > { %v807_v35 = vpop.f32.mrb[2].mxu1 }
 0x274   : > { %v874_v21 = vpop.f32.mrb[4].mxu0  ;;  %v810_v36 = vpack.c.bf16 %v805_v33, %v805_v33  ;;  %v1766_v37 = vpop.f32.mrb[3].mxu1 }
 0x275   : > { %v875_v22 = vadd.f32 %v1697_v20, %v874_v21  ;;  %v1773_v23 = vpop.f32.mrb[5].mxu0 }
 0x276   : > { %v877_v24 = vpop.f32.mrb[6].mxu0  ;;  %811 = vst.msk [vmem:[#allocation3] sm:$0xf] %vm734_vm5, %v810_v36 }
 0x277   : > { %v880_v25 = vmul.f32 0.17677669, %v875_v22  ;;  %v1774_v26 = vpop.f32.mrb[7].mxu0 }
 0x278   : > { %v882_v27 = vld [vmem:[#allocation2] sm:$0xf] }
 0x279   : > { %v896_v28 = vsel %vm891_vm6, %v882_v27, 0  ;;  %v1704_v29 = vcombine.low %v882_v27, %v882_v27  ;;  %v881_v30 = vpack.c.bf16 %v880_v25, %v880_v25 }
 0x27a   : > { %1776 = vmatpush3.bf16.xpose.msra.mxu1 %v896_v28 }
 0x27b   : > { %1123 = vrot.lane.b32.xlu1 %v1704_v29, %s2498_s27  ;;  %1004 = vrot.lane.b32.xlu0 %v1704_v29, %s2499_s30 }
 0x27c   : > { %1787 = vmatprep.subr.bf16.mxu1 %v2496_v0 }
 0x27d   : > { %v883_v38 = vld [vmem:[#allocation3] sm:$0xf] }
 0x27e   : > { %v953_v39 = vsel %vm689_vm1, %v883_v38, 0  ;;  %v1706_v11 = vcombine.low %v883_v38, %v883_v38 }
 0x27f   : > { %1121 = vrot.lane.b32.xlu1 %v881_v30, %s2498_s27  ;;  %999 = vrot.lane.b32.xlu0 %v881_v30, %s2499_s30 }
 0x280   : > { %1782 = vmatpush3.bf16.msra.mxu0 %v953_v39 }
 0x281   : > { %1778 = vmatmul.mubr.msk.bf16.vlgmr.msra.gmra.mrb[4].mxu1 %vm891_vm6, %v881_v30  ;;  %1793 = vmatprep.subr.bf16.mxu0 %v2496_v0 }
 0x282   : > { %1789 = vmatprep.mubr.msk.bf16.mxu1 %vm2497_vm0, %v2496_v0 }
 0x283   : > { %1237 = vrot.lane.b32.xlu1 %v881_v30, %s2500_s17  ;;  %1239 = vrot.lane.b32.xlu0 %v1704_v29, %s2500_s17 }
 0x2ed   : > { %v1005_v40 = vpop.permute.xlu0 %1004  ;;  %v1124_v42 = vpop.permute.xlu1 %1123 }
 0x2ee   : > { %v1010_v41 = vsel %vm891_vm6, %v1005_v40, 0  ;;  %v1129_v44 = vsel %vm891_vm6, %v1124_v42, 0 }
 0x2ef   : > { %1788 = vmatpush3.bf16.xpose.msra.mxu1 %v1010_v41 }
 0x2f0   : > { %1799 = vmatprep.subr.bf16.mxu1 %v2496_v0 }
 0x2f1   : > { %v1000_v43 = vpop.permute.xlu0 %999  ;;  %v1122_v46 = vpop.permute.xlu1 %1121 }
 0x2f5   : > { %v1240_v45 = vpop.permute.xlu0 %1239  ;;  %v1238_v48 = vpop.permute.xlu1 %1237 }
 0x2f6   : > { %1790 = vmatmul.mubr.msk.bf16.vlgmr.msra.gmra.mrb[8].mxu1 %vm891_vm6, %v1000_v43  ;;  %v1245_v47 = vsel %vm891_vm6, %v1240_v45, 0 }
 0x2f7   : > { %1800 = vmatpush3.bf16.xpose.msra.mxu1 %v1129_v44  ;;  %1801 = vmatprep.mubr.msk.bf16.mxu1 %vm2497_vm0, %v2496_v0 }
 0x2f8   : > { %1811 = vmatprep.subr.bf16.mxu1 %v2496_v0 }
 0x2fe   : > { %1802 = vmatmul.mubr.msk.bf16.vlgmr.msra.gmra.mrb[12].mxu1 %vm891_vm6, %v1122_v46 }
 0x2ff   : > { %1812 = vmatpush3.bf16.xpose.msra.mxu1 %v1245_v47  ;;  %1813 = vmatprep.mubr.msk.bf16.mxu1 %vm2497_vm0, %v2496_v0 }
 0x300   : > { %1823 = vmatprep.subr.bf16.mxu1 %v2496_v0 }
 0x306   : > { %1814 = vmatmul.mubr.msk.bf16.vlgmr.msra.gmra.mrb[16].mxu1 %vm891_vm6, %v1238_v48 }
 0x307   : > { %1827 = vmatprep.mubr.msk.bf16.mxu1 %vm2497_vm0, %v2496_v0 }
 0x354   : > { %v932_v50 = vpop.f32.mrb[4].mxu1 }
 0x355   : > { %v933_v51 = vadd.f32 %v1701_v49, %v932_v50  ;;  %v1779_v52 = vpop.f32.mrb[5].mxu1 }
 0x356   : > { %v935_v53 = vpop.f32.mrb[6].mxu1 }
 0x357   : > { %v1780_v54 = vpop.f32.mrb[7].mxu1  ;;  %v938_v55 = vsel %vm891_vm6, %v933_v51, -inf }
 0x358   : > { %939 = vmax.xlane.f32.xlu0 %v938_v55 }
 0x3c9   : > { %v1046_v56 = vpop.f32.mrb[8].mxu1 }
 0x3ca   : > { %v1047_v57 = vadd.f32 %v1701_v49, %v1046_v56  ;;  %v1791_v58 = vpop.f32.mrb[9].mxu1 }
 0x3cb   : > { %v1049_v59 = vpop.f32.mrb[10].mxu1  ;;  %v2008_v58 = vld [vmem:[#allocation22] sm:$0xff]  }
 0x3cc   : > { %v1792_v60 = vpop.f32.mrb[11].mxu1  ;;  %v1052_v61 = vsel %vm891_vm6, %v1047_v57, -inf  ;;  %1824 = vmatpush3.bf16.msra.mxu1 %v2008_v58 }
 0x3cd   : > { %1053 = vmax.xlane.f32.xlu1 %v1052_v61  ;;  %v2009_v61 = vld [vmem:[#allocation22 + $0x8] sm:$0xff]   ;;  %1825 = vmatprep.subr.bf16.mxu1 %v2496_v0 }
 0x3d0   : > { %1826 = vmatpush3.bf16.msra.mxu1 %v2009_v61 }
 0x3d1   : > { %v1165_v62 = vpop.f32.mrb[12].mxu1 }
 0x3d2   : > { %v1166_v63 = vadd.f32 %v1701_v49, %v1165_v62  ;;  %v1803_v1 = vpop.f32.mrb[13].mxu1 }
 0x3d3   : > { %v1168_v2 = vpop.f32.mrb[14].mxu1 }
 0x3d4   : > { %v1804_v3 = vpop.f32.mrb[15].mxu1  ;;  %v1171_v4 = vsel %vm891_vm6, %v1166_v63, -inf }
 0x3d5   : > { %1172 = vmax.xlane.f32.xlu0 %v1171_v4 }
 0x3d9   : > { %v1281_v5 = vpop.f32.mrb[16].mxu1 }
 0x3da   : > { %v1282_v6 = vadd.f32 %v1701_v49, %v1281_v5  ;;  %v1815_v7 = vpop.f32.mrb[17].mxu1 }
 0x3db   : > { %v1284_v8 = vpop.f32.mrb[18].mxu1 }
 0x3dc   : > { %v1816_v9 = vpop.f32.mrb[19].mxu1  ;;  %v1287_v10 = vsel %vm891_vm6, %v1282_v6, -inf }
 0x3dd   : > { %1288 = vmax.xlane.f32.xlu0 %v1287_v10 }
 0x3de   : > { %1065 = vrot.lane.b32.xlu1 %v1706_v11, %s2499_s30 }
 0x3e2   : > { %1297 = vrot.lane.b32.xlu1 %v1706_v11, %s2500_s17 }
 0x3e5   : > { %v940_v12 = vpop.xlane.xlu0 %939 }
 0x3e6   : > { %v941_v13 = vsub.f32 %v933_v51, %v940_v12 }
 0x3e8   : > { %v942_v14 = vmul.f32 1.442695, %v941_v13  ;;  %v1712_v13 = vld [vmem:[#allocation23] ss:$0 sm:$0xff] }
 0x3ea   : > { %2010 = vpow2.f32 %v942_v14 }
 0x3f3   : > { %1181 = vrot.lane.b32.xlu0 %v1706_v11, %s2498_s27 }
 0x3f4   : > { %v2011_v15 = vpop.eup %2010 }
 0x3f5   : > { %v947_v16 = vpack.c.bf16 %v2011_v15, %v2011_v15  ;;  %v944_v32 = vsel %vm891_vm6, %v2011_v15, 0.0 }
 0x3f7   : > { %1784 = vmatmul.mubr.msk.bf16.vlgmr.msra.gmra.mrb[8].mxu0 %vm891_vm6, %v947_v16 }
 0x3f8   : > { %1795 = vmatprep.mubr.msk.bf16.mxu0 %vm2497_vm0, %v2496_v0 }
 0x45a   : > { %v1054_v17 = vpop.xlane.xlu1 %1053 }
 0x45b   : > { %v1055_v18 = vsub.f32 %v1047_v57, %v1054_v17 }
 0x45d   : > { %v1056_v19 = vmul.f32 1.442695, %v1055_v18 }
 0x45e   : > { %v1066_v20 = vpop.permute.xlu1 %1065 }
 0x45f   : > { %2012 = vpow2.f32 %v1056_v19  ;;  %v1071_v21 = vsel %vm689_vm1, %v1066_v20, 0 }
 0x460   : > { %1794 = vmatpush3.bf16.msra.mxu0 %v1071_v21 }
 0x461   : > { %1805 = vmatprep.subr.bf16.mxu0 %v2496_v0 }
 0x462   : > { %v1173_v22 = vpop.xlane.xlu0 %1172  ;;  %v1298_v35 = vpop.permute.xlu1 %1297 }
 0x463   : > { %v1174_v23 = vsub.f32 %v1166_v63, %v1173_v22  ;;  %v1303_v38 = vsel %vm689_vm1, %v1298_v35, 0 }
 0x465   : > { %v1175_v24 = vmul.f32 1.442695, %v1174_v23 }
 0x467   : > { %2014 = vpow2.f32 %v1175_v24 }
 0x469   : > { %v2013_v25 = vpop.eup %2012 }
 0x46a   : > { %v1289_v26 = vpop.xlane.xlu0 %1288  ;;  %v1058_v27 = vsel %vm891_vm6, %v2013_v25, 0.0  ;;  %v1061_v28 = vpack.c.bf16 %v2013_v25, %v2013_v25 }
 0x46b   : > { %v1290_v29 = vsub.f32 %v1282_v6, %v1289_v26  ;;  %1059 = vadd.xlane.f32.xlu1 %v1058_v27 }
 0x46c   : > { %1796 = vmatmul.mubr.msk.bf16.vlgmr.msra.gmra.mrb[12].mxu0 %vm891_vm6, %v1061_v28 }
 0x46d   : > { %v1291_v30 = vmul.f32 1.442695, %v1290_v29  ;;  %1807 = vmatprep.mubr.msk.bf16.mxu0 %vm2497_vm0, %v2496_v0 }
 0x46e   : > { %v1182_v31 = vpop.permute.xlu0 %1181 }
 0x46f   : > { %2016 = vpow2.f32 %v1291_v30  ;;  %v1187_v33 = vsel %vm689_vm1, %v1182_v31, 0  ;;  %945 = vadd.xlane.f32.xlu1 %v944_v32 }
 0x470   : > { %1806 = vmatpush3.bf16.msra.mxu0 %v1187_v33 }
 0x471   : > { %v2015_v34 = vpop.eup %2014  ;;  %1817 = vmatprep.subr.bf16.mxu0 %v2496_v0 }
 0x472   : > { %v1177_v36 = vsel %vm891_vm6, %v2015_v34, 0.0  ;;  %v1180_v37 = vpack.c.bf16 %v2015_v34, %v2015_v34 }
 0x473   : > { %1178 = vadd.xlane.f32.xlu0 %v1177_v36 }
 0x474   : > { %1808 = vmatmul.mubr.msk.bf16.vlgmr.msra.gmra.mrb[16].mxu0 %vm891_vm6, %v1180_v37 }
 0x475   : > { %1818 = vmatpush3.bf16.msra.mxu0 %v1303_v38  ;;  %1819 = vmatprep.mubr.msk.bf16.mxu0 %vm2497_vm0, %v2496_v0 }
 0x479   : > { %v2017_v39 = vpop.eup %2016 }
 0x47a   : > { %v1293_v40 = vsel %vm891_vm6, %v2017_v39, 0.0  ;;  %v1296_v41 = vpack.c.bf16 %v2017_v39, %v2017_v39 }
 0x47b   : > { %1294 = vadd.xlane.f32.xlu0 %v1293_v40 }
 0x47c   : > { %1820 = vmatmul.mubr.msk.bf16.vlgmr.msra.gmra.mrb[20].mxu0 %vm891_vm6, %v1296_v41 }
 0x4ca   : > { %v989_v42 = vpop.f32.mrb[8].mxu0 }
 0x4cb   : > { %v1785_v43 = vpop.f32.mrb[9].mxu0 }
 0x4cc   : > { %v992_v44 = vpop.f32.mrb[10].mxu0 }
 0x4cd   : > { %v1786_v45 = vpop.f32.mrb[11].mxu0 }
 0x4f8   : > { %v1060_v46 = vpop.xlane.xlu1 %1059 }
 0x4fc   : > { %v946_v47 = vpop.xlane.xlu1 %945 }
 0x4fd   : > { %2018 = vrcp.f32 %v946_v47 }
 0x4fe   : > { %2020 = vrcp.f32 %v1060_v46 }
 0x500   : > { %v1179_v50 = vpop.xlane.xlu0 %1178 }
 0x501   : > { %2022 = vrcp.f32 %v1179_v50 }
 0x507   : > { %v2019_v48 = vpop.eup %2018 }
 0x508   : > { %v996_v49 = vmul.f32 %v2019_v48, %v989_v42  ;;  %v2021_v51 = vpop.eup %2020  ;;  %v1295_v56 = vpop.xlane.xlu0 %1294 }
 0x509   : > { %2024 = vrcp.f32 %v1295_v56 }
 0x50a   : > { %997 = vst.msk [vmem:[#allocation4] sm:$0xff] %vm891_vm6, %v996_v49 }
 0x50b   : > { %v2023_v59 = vpop.eup %2022 }
 0x513   : > { %v2025_v3 = vpop.eup %2024 }
 0x53f   : > { %v1107_v52 = vpop.f32.mrb[12].mxu0 }
 0x540   : > { %v1114_v53 = vmul.f32 %v2021_v51, %v1107_v52  ;;  %v1797_v54 = vpop.f32.mrb[13].mxu0 }
 0x541   : > { %v1110_v55 = vpop.f32.mrb[14].mxu0 }
 0x542   : > { %1116 = vrot.lane.b32.xlu0 %v1114_v53, %s2501_s24  ;;  %v1798_v57 = vpop.f32.mrb[15].mxu0 }
 0x547   : > { %v1223_v60 = vpop.f32.mrb[16].mxu0 }
 0x548   : > { %v1230_v62 = vmul.f32 %v2023_v59, %v1223_v60  ;;  %v1809_v63 = vpop.f32.mrb[17].mxu0 }
 0x549   : > { %v1226_v1 = vpop.f32.mrb[18].mxu0 }
 0x54a   : > { %1232 = vrot.lane.b32.xlu1 %v1230_v62, %s2502_s29  ;;  %v1810_v2 = vpop.f32.mrb[19].mxu0 }
 0x54f   : > { %v1339_v4 = vpop.f32.mrb[20].mxu0 }
 0x550   : > { %v1346_v5 = vmul.f32 %v2025_v3, %v1339_v4  ;;  %v1821_v6 = vpop.f32.mrb[21].mxu0 }
 0x551   : > { %v1342_v7 = vpop.f32.mrb[22].mxu0 }
 0x552   : > { %1348 = vrot.lane.b32.xlu1 %v1346_v5, %s2503_s6  ;;  %v1822_v8 = vpop.f32.mrb[23].mxu0 }
 0x5b4   : > { %v1117_v9 = vpop.permute.xlu0 %1116 }
 0x5b5   : > { %1120 = vst.msk [vmem:[#allocation4] sm:$0xff] %vm1119_vm7, %v1117_v9 }
 0x5bc   : > { %v1233_v0 = vpop.permute.xlu1 %1232 }
 0x5bd   : > { %1236 = vst.msk [vmem:[#allocation4] sm:$0xff] %vm1235_vm8, %v1233_v0 }
 0x5c4   : > { %v1349_v10 = vpop.permute.xlu1 %1348 }
 0x5c5   : > { %1352 = vst.msk [vmem:[#allocation4] sm:$0xff] %vm1351_vm9, %v1349_v10 }
 0x5cc   : > { %v1353_v11 = vld [vmem:[#allocation4] sm:$0xff] }
 0x5cd   : > { %v1354_v12 = vpack.c.bf16 %v1353_v11, %v1353_v11 }
 0x5cf   : > { %1828 = vmatmul.mubr.msk.bf16.vlgmr.msra.gmra.mrb[20].mxu1 %vm836_vm3, %v1354_v12 }
 0x6a2   : > { %v1415_v14 = vpop.f32.mrb[20].mxu1 }
 0x6a3   : > { %v1416_v15 = vadd.f32 %v1712_v13, %v1415_v14  ;;  %v1829_v16 = vpop.f32.mrb[21].mxu1 }
 0x6a4   : > { %v1418_v17 = vpop.f32.mrb[22].mxu1 }
 0x6a5   : > { %v1830_v18 = vpop.f32.mrb[23].mxu1  ;;  %1421 = vst.msk [vmem:[%s658_s21] sm:$0xff] %vm836_vm3, %v1416_v15 }
 0x6a6   : > { %2383 = shalt.err (!%p2380_p12)
}
 0x6a7   : > { %s2384_s9 = scalar_lea.hbm %s3120_s0, 128  ;;  %s2388_s17 = scalar_lea.hbm %s3268_s28, 256 }
 0x6a8   : > { %p2385_p6 = scmp.ne.s32.totalorder %s3120_s0, %s2384_s9  ;;  %p2389_p1 = scmp.lt.u32.totalorder %s3120_s0, %s3268_s28 }
 0x6a9   : > { %p2390_p10 = scmp.lt.u32.totalorder %s2388_s17, %s2384_s9  ;;  %p2392_p2 = scmp.lt.u32.totalorder %s2384_s9, %s3120_s0 }
 0x6aa   : > { %p2386_p9 = pnand %p2385_p6, %p3269_p4 }
 0x6ab   : > { %p2391_p5 = por %p2390_p10, %p2389_p1 }
 0x6ac   : > { %p2387_p0 = pneg %p2386_p9 }
 0x6ad   : > { %p2393_p13 = por %p2392_p2, %p2391_p5 }
 0x6af   : > { %p2394_p3 = pnand %p2393_p13, %p2387_p0 }
 0x6b1   : > { %2397 = shalt.err (!%p2394_p3)
}
 0x6b2   : > { %1871 = dma.vmem_to_hbm [thread:$0]  (%p3269_p4), %s3122_s16, 128, %s3120_s0, %s1423_s23  }
 0x6b3 PF: > { %s3270_s6 = sld [smem:[#allocation35_spill]]  ;;  %s3271_s5 = sld [smem:[#allocation41_spill]] }
 0x6b4   : > { %p3273_p7 = scmp.ge.s32.totalorder %s2480_s26, 2 }
 0x6b9   : > { %s1449_s20 = sand.u32 1, %s3270_s6   ;;  %p3272_p11 = scmp.ne.s32.totalorder %s3271_s5, 0 }
 0x6ba   : > { %s1450_s15 = scalar_lea.sflag [#allocation7], %s1449_s20 }
 0x6bb   : > { %p1912_p8 = pnand %p3273_p7, %p3272_p11 }
 0x6bd   : > { %2455 = dma.done.wait (!%p1912_p8), %s1450_s15, 128  }
 0x6be   : > { %2457 = vsyncadd (!%p1912_p8), %s1450_s15, 4294967168  ;;  %s38_s26 = sadd.s32 1, %s2480_s26   ;;  %s3274_s4 = sld [smem:[#allocation36_spill]] }
 0x6bf   : > { %p35_p12 = scmp.ge.s32.totalorder %s38_s26, 4   ;;  %s3275_s23 = sld [smem:[#allocation40_spill]] }
 0x6c0   : > { %s3276_s3 = sld [smem:[#allocation39_spill]]  ;;  %s3277_s21 = smov %s2464_s22 }
 0x6c1   : > { %s3279_s24 = smov %s2476_s25  ;;  %37 = sbr.rel (!%p35_p12) target bundleno = 25 (0x19), region = 186 }
 0x6c4   : > { %s3278_s22 = smov %s3274_s4 }
 0x6c6   : > { %s3280_s25 = smov %s3276_s3 }
 0x6c8   :  { %1455 = vsyncpa [#allocation6], 1 }
 0x6c9   :  { %1457 = vsyncpa [#allocation6 + $0x1], 1 }
 0x6ca   :  { %1458 = vsyncpa [#allocation9], 1 }
 0x6cb   :  { %1460 = vsyncpa [#allocation9 + $0x1], 1 }
 0x6cc   :  { %1461 = vsyncpa [#allocation12], 1 }
 0x6cd   :  { %1463 = vsyncpa [#allocation12 + $0x1], 1 }
 0x6ce   :  { %1464 = vsyncpa [#allocation15], 1 }
 0x6cf   :  { %1465 = vsyncpa [#allocation18], 1 }
 0x6d0   :  { %1466 = vsyncpa [#allocation21], 1 }
 0x6d1   :  { %1467 = vsyncpa [#allocation24], 1 }
 0x6d2   :  { %1468 = vsyncpa [#allocation7], 1 }
 0x6d3   :  { %1470 = vsyncpa [#allocation7 + $0x1], 1 }

</bundles_post_ra>
